<compile_context>
chip_gen: v6e
topology: v6e:2x2x1
jax: 0.10.0
libtpu: 0.0.40
codegen_flags: <defaults>
</compile_context>

<pallas_src>
import math
import functools

import jax
import jax.numpy as jnp
from jax.experimental import pallas as pl
from jax.experimental.pallas import tpu as pltpu


# ---------------------------------------------------------------------------
# boundary folds (with clamping -> indices always in range)
# ---------------------------------------------------------------------------

def _fold_wrap(i, n):
    # 'dft' boundary: periodic wrap, clamped for float-rounding safety.
    nf = float(n)
    m = i - jnp.floor(i * (1.0 / nf)) * nf
    return jnp.clip(m, 0.0, nf - 1.0)


def _fold_reflect(i, n):
    # 'dct2' boundary: symmetric reflection with edge voxel repeated, clamped.
    nf = float(n)
    p = 2.0 * nf
    m = i - jnp.floor(i * (1.0 / p)) * p
    m = jnp.clip(m, 0.0, p - 1.0)
    r = jnp.where(m >= nf, p - 1.0 - m, m)
    return jnp.clip(r, 0.0, nf - 1.0)


def _separable_onehots(gy, gx, H, W, reflect):
    """Separable bilinear weight matrices for a (1, T) chunk of sample points.

    Returns Ay (H, T), Ax (W, T) such that
      pulled[p] = sum_j Ay[j, p] * sum_i field[j, i] * Ax[i, p]
    """
    T = gy.shape[-1]
    iota_h = jax.lax.broadcasted_iota(jnp.int32, (H, T), 0)
    iota_w = jax.lax.broadcasted_iota(jnp.int32, (W, T), 0)
    fold = _fold_reflect if reflect else _fold_wrap
    y0f = jnp.floor(gy)
    x0f = jnp.floor(gx)
    wy1 = gy - y0f
    wy0 = 1.0 - wy1
    wx1 = gx - x0f
    wx0 = 1.0 - wx1
    y0 = (fold(y0f, H) + 0.5).astype(jnp.int32)
    y1 = (fold(y0f + 1.0, H) + 0.5).astype(jnp.int32)
    x0 = (fold(x0f, W) + 0.5).astype(jnp.int32)
    x1 = (fold(x0f + 1.0, W) + 0.5).astype(jnp.int32)
    Ay = jnp.where(iota_h == y0, wy0, 0.0) + jnp.where(iota_h == y1, wy1, 0.0)
    Ax = jnp.where(iota_w == x0, wx0, 0.0) + jnp.where(iota_w == x1, wx1, 0.0)
    return Ay, Ax


def _identity_chunk(off, T, W):
    """Identity grid coordinates for flat positions [off, off+T) via the
    float-reciprocal trick (exact for H*W < 2^23)."""
    pf = (jax.lax.broadcasted_iota(jnp.int32, (1, T), 1) + off).astype(jnp.float32)
    idy = jnp.floor((pf + 0.5) * (1.0 / float(W)))
    idx = pf - idy * float(W)
    return idy, idx


# ---------------------------------------------------------------------------
# Pallas kernels
# ---------------------------------------------------------------------------

def _smooth_kernel(kh_ref, kwt_ref, x_ref, o_ref):
    """Per-slice separable Gaussian smoothing: o = Kh @ x @ Kw^T."""
    y = jnp.dot(x_ref[0], kwt_ref[...], preferred_element_type=jnp.float32)
    o_ref[0] = jnp.dot(kh_ref[...], y, preferred_element_type=jnp.float32)


def _exp_kernel(vel_ref, u_ref, um_ref, *, H, W, T, NC, steps, mm_dtype):
    """Fused scaling-and-squaring: u <- u + u o (id + u), 'dft' (wrap) bound.

    vel_ref : (1, 2, NC, T) velocity field (flat spatial axis split in NC lane tiles)
    u_ref   : (1, 2, NC, T) output; used directly as the in-VMEM accumulator.
    um_ref  : (2*H, W) scratch; per-step snapshot of the field = gather matmul LHS.
    """
    u_ref[...] = vel_ref[...] * (1.0 / (2.0 ** steps))

    def chunk_update(c):
        off = c * T
        if not isinstance(off, int):
            off = pl.multiple_of(off, 128)
        idy, idx = _identity_chunk(off, T, W)
        u0c = u_ref[0, 0:1, c, :]                    # (1, T)
        u1c = u_ref[0, 1:2, c, :]
        gy = idy + u0c
        gx = idx + u1c
        Ay, Ax = _separable_onehots(gy, gx, H, W, reflect=False)
        tmp = jnp.dot(um_ref[...], Ax.astype(mm_dtype),
                      preferred_element_type=jnp.float32)            # (2H, T)
        p0 = jnp.sum(Ay * tmp[0:H, :], axis=0, keepdims=True)        # (1, T)
        p1 = jnp.sum(Ay * tmp[H:2 * H, :], axis=0, keepdims=True)
        # In-place chunk update is safe: the gather reads the um_ref snapshot,
        # and later chunks read disjoint lanes of u_ref.
        u_ref[0, 0:1, c, :] = u0c + p0
        u_ref[0, 1:2, c, :] = u1c + p1

    def step_body(_, carry):
        # Snapshot the current field as the (2H, W) gather matmul LHS.
        if W % 128 == 0:
            um_ref[...] = jnp.reshape(u_ref[0], (2 * H, W)).astype(mm_dtype)
        else:
            # W not lane-aligned: NC == 1, rows are static lane slices of the
            # flat field, stored straight into the scratch (no concatenate).
            # TODO(synk): a 4-neighbour lane-group factorisation would avoid
            # this relayout for W not a multiple of 128.
            for j in range(H):
                um_ref[j:j + 1, :] = \
                    u_ref[0, 0:1, 0, j * W:(j + 1) * W].astype(mm_dtype)
                um_ref[H + j:H + j + 1, :] = \
                    u_ref[0, 1:2, 0, j * W:(j + 1) * W].astype(mm_dtype)

        if NC <= 8:
            for c in range(NC):                      # static, small
                chunk_update(c)
        else:
            def chunk_body(c, carry2):
                chunk_update(c)
                return carry2
            jax.lax.fori_loop(0, NC, chunk_body, 0)
        return carry

    jax.lax.fori_loop(0, steps, step_body, 0)


def _pull_kernel(aff_ref, img_ref, u_ref, warped_ref, grid_ref, *, H, W, C, T):
    """Apply the affine to the diffeo grid, then bilinear-pull the image ('dct2').

    aff_ref    : (B, 8) in SMEM: a00, a01, a10, a11, t0, t1, pad, pad
    img_ref    : (1, C*H, W) image block (resident across the column-tile axis)
    u_ref      : (1, 2, T)  column tile of the diffeomorphic displacement
    warped_ref : (1, C, T)  column tile of the warped image
    grid_ref   : (1, 2, T)  column tile of the resampling grid
    """
    b = pl.program_id(0)
    col = pl.program_id(1)
    off = pl.multiple_of(col * T, 128)

    idy, idx = _identity_chunk(off, T, W)
    gy0 = idy + u_ref[0, 0:1, :]
    gx0 = idx + u_ref[0, 1:2, :]

    a00 = aff_ref[b, 0]
    a01 = aff_ref[b, 1]
    a10 = aff_ref[b, 2]
    a11 = aff_ref[b, 3]
    t0 = aff_ref[b, 4]
    t1 = aff_ref[b, 5]

    # grid = matvec(lin, id + u) + off
    gy = a00 * gy0 + a01 * gx0 + t0
    gx = a10 * gy0 + a11 * gx0 + t1
    grid_ref[0, 0:1, :] = gy
    grid_ref[0, 1:2, :] = gx

    # TODO(synk): when H > W, contract over H instead of W to fill the MXU better.
    Ay, Ax = _separable_onehots(gy, gx, H, W, reflect=True)
    img2 = img_ref[0]                                               # (C*H, W)
    tmp = jnp.dot(img2, Ax.astype(img2.dtype),
                  preferred_element_type=jnp.float32)               # (C*H, T)
    for cc in range(C):
        warped_ref[0, cc:cc + 1, :] = jnp.sum(
            Ay * tmp[cc * H:(cc + 1) * H, :], axis=0, keepdims=True
        ).astype(warped_ref.dtype)


# ---------------------------------------------------------------------------
# pallas_call wrappers
# ---------------------------------------------------------------------------

def gaussian_smooth(noise, kh, kwt):
    """noise: (N, H, W) slices; kh: (H, H); kwt: (W, W) = Kw^T."""
    N, H, W = noise.shape
    return pl.pallas_call(
        _smooth_kernel,
        out_shape=jax.ShapeDtypeStruct((N, H, W), jnp.float32),
        grid=(N,),
        in_specs=[pl.BlockSpec((H, H), lambda i: (0, 0)),
                  pl.BlockSpec((W, W), lambda i: (0, 0)),
                  pl.BlockSpec((1, H, W), lambda i: (i, 0, 0))],
        out_specs=pl.BlockSpec((1, H, W), lambda i: (i, 0, 0)),
        compiler_params=pltpu.CompilerParams(dimension_semantics=("parallel",)),
    )(kh, kwt, noise)


def exp_grid(vel4, H, W, T, NC, steps, mm_dtype):
    """vel4: (B, 2, NC, T) velocity -> (B, 2, NC, T) diffeomorphic displacement."""
    B = vel4.shape[0]
    HWp = NC * T
    mm_bytes = jnp.dtype(mm_dtype).itemsize
    blk = 2 * HWp * 4
    inter = (2 * H * T) * 4 + (H + W) * T * 8 + 2 * H * W * mm_bytes
    vmem = int(min(max(4 * blk + 2 * inter + (4 << 20), 32 << 20), 64 << 20))
    flops = int(2 * (2 * H) * W * HWp * steps * B)
    byt = int(2 * 2 * HWp * 4 * B)
    return pl.pallas_call(
        functools.partial(_exp_kernel, H=H, W=W, T=T, NC=NC, steps=steps,
                          mm_dtype=mm_dtype),
        out_shape=jax.ShapeDtypeStruct((B, 2, NC, T), jnp.float32),
        grid=(B,),
        in_specs=[pl.BlockSpec((1, 2, NC, T), lambda b: (b, 0, 0, 0))],
        out_specs=pl.BlockSpec((1, 2, NC, T), lambda b: (b, 0, 0, 0)),
        scratch_shapes=[pltpu.VMEM((2 * H, W), mm_dtype)],
        compiler_params=pltpu.CompilerParams(
            dimension_semantics=("parallel",), vmem_limit_bytes=vmem),
        cost_estimate=pl.CostEstimate(flops=flops, transcendentals=0,
                                      bytes_accessed=byt),
    )(vel4)


def affine_pull(aff8, img2, u_flat, H, W, HWp, C, T):
    """aff8: (B, 8) f32 (SMEM); img2: (B, C*H, W); u_flat: (B, 2, HWp)."""
    B, CH, _ = img2.shape
    NCp = HWp // T
    img_bytes = jnp.dtype(img2.dtype).itemsize
    blk = CH * W * img_bytes + 2 * T * 4 + C * T * 4 + 2 * T * 4
    inter = CH * T * 4 + (H + W) * T * 8
    vmem = int(min(max(4 * blk + 2 * inter + (4 << 20), 32 << 20), 64 << 20))
    flops = int(2 * CH * W * HWp * B)
    byt = int(B * (CH * W * img_bytes + (2 + C + 2) * HWp * 4))
    return pl.pallas_call(
        functools.partial(_pull_kernel, H=H, W=W, C=C, T=T),
        out_shape=(jax.ShapeDtypeStruct((B, C, HWp), jnp.float32),
                   jax.ShapeDtypeStruct((B, 2, HWp), jnp.float32)),
        grid=(B, NCp),
        in_specs=[pl.BlockSpec(memory_space=pltpu.MemorySpace.SMEM),
                  pl.BlockSpec((1, CH, W), lambda b, c: (b, 0, 0)),
                  pl.BlockSpec((1, 2, T), lambda b, c: (b, 0, c))],
        out_specs=(pl.BlockSpec((1, C, T), lambda b, c: (b, 0, c)),
                   pl.BlockSpec((1, 2, T), lambda b, c: (b, 0, c))),
        compiler_params=pltpu.CompilerParams(
            dimension_semantics=("parallel", "parallel"), vmem_limit_bytes=vmem),
        cost_estimate=pl.CostEstimate(flops=flops, transcendentals=0,
                                      bytes_accessed=byt),
    )(aff8, img2, u_flat)


# ---------------------------------------------------------------------------
# Plain-JAX glue (parameter sampling / tiny 3x3 algebra / layout plumbing)
# ---------------------------------------------------------------------------

def _pick_tile(total_lanes, target):
    """Largest multiple of 128 that divides total_lanes and is <= target."""
    d = total_lanes // 128
    best = 1
    hi = min(d, max(target // 128, 1))
    for cand in range(1, hi + 1):
        if d % cand == 0:
            best = cand
    return 128 * best


def _smooth_matrix(n, fwhm):
    sigma = fwhm / math.sqrt(8.0 * math.log(2.0))
    i = jnp.arange(n, dtype=jnp.float32)[:, None]
    j = jnp.arange(n, dtype=jnp.float32)[None, :]
    k = jnp.exp(-0.5 * ((i - j) / sigma) ** 2)
    return k / jnp.sum(k, axis=1, keepdims=True)


def affine_sample_2d(key, batch):
    """Sample a (batch, 3, 3) affine matrix following AffineSample defaults (dim=2)."""
    kt, kr, kz, ks = jax.random.split(key, 4)
    trans = 5.0 * jax.random.normal(kt, (batch, 2), jnp.float32)                    # Normal(0, 5) voxels
    rot = (0.1 * jax.random.normal(kr, (batch,), jnp.float32)) * (math.pi / 180.0)  # degrees -> rad
    zoom = jnp.exp((math.log(2.0) / 3.0) * jax.random.normal(kz, (batch, 2), jnp.float32))
    shear = 0.01 * jax.random.normal(ks, (batch,), jnp.float32)

    O = jnp.zeros((batch,), jnp.float32)
    I = jnp.ones((batch,), jnp.float32)
    c, s = jnp.cos(rot), jnp.sin(rot)

    def mat3(rows):
        return jnp.stack([jnp.stack(r, axis=-1) for r in rows], axis=-2)

    T = mat3([[I, O, trans[:, 0]], [O, I, trans[:, 1]], [O, O, I]])
    R = mat3([[c, -s, O], [s, c, O], [O, O, I]])
    Z = mat3([[zoom[:, 0], O, O], [O, zoom[:, 1], O], [O, O, I]])
    S = mat3([[I, shear, O], [O, I, O], [O, O, I]])
    # TODO(synk): nitorch affine_matrix_classic may use a slightly different
    # composition order; T @ R @ Z @ S is used here.
    return T @ R @ Z @ S


def deformed_sample(image, key, vel_amplitude=15.0, vel_fwhm=10.0, exp_steps=8,
                    tile=512, pull_matmul_dtype=jnp.bfloat16,
                    exp_matmul_dtype=jnp.bfloat16):
    """Forward pass of DeformedSample for 2-D images.

    image : (B, C, H, W) float32  -> returns (warped (B,C,H,W), grid (B,H,W,2))
    """
    image = jnp.asarray(image, jnp.float32)
    B, C, H, W = image.shape
    HW = H * W
    HWp = HW if HW % 128 == 0 else ((HW + 127) // 128) * 128
    # lane tiles of the flattened sample axis; `tile` is the generation-tunable
    # target (512 works on v5e/v6e/v7x; larger is fine on 128 MiB-VMEM chips)
    T_pull = _pick_tile(HWp, tile)
    if W % 128 == 0:
        T_exp = _pick_tile(HWp, tile)
    else:
        # TODO(synk): chunk the exp kernel for large images whose W is not a
        # multiple of 128 (currently processed in a single lane tile).
        T_exp = HWp
    NC = HWp // T_exp

    k_noise, k_aff = jax.random.split(key)

    # --- velocity field: smoothed Gaussian noise (RandomFieldSample) ------------
    # TODO(synk): nitorch RandomFieldSample's exact amplitude normalisation of the
    # *smoothed* field is not reproduced; white noise is scaled by the amplitude.
    noise = vel_amplitude * jax.random.normal(k_noise, (B * 2, H, W), jnp.float32)
    kh = _smooth_matrix(H, vel_fwhm)
    kw = _smooth_matrix(W, vel_fwhm)
    vel2 = gaussian_smooth(noise, kh, kw.T)                          # (B*2, H, W)

    vel = vel2.reshape(B, 2, HW)
    if HWp > HW:
        vel = jnp.pad(vel, ((0, 0), (0, 0), (0, HWp - HW)))
    vel4 = vel.reshape(B, 2, NC, T_exp)

    # --- GridExp: scaling and squaring, bound='dft', linear interp (fused) ------
    u = exp_grid(vel4, H, W, T_exp, NC, exp_steps, exp_matmul_dtype)
    u = u.reshape(B, 2, HWp)

    # --- AffineSample + recentring: aff = shift^-1 @ (A @ shift) -----------------
    A = affine_sample_2d(k_aff, B)                                   # (B, 3, 3)
    shift = jnp.array([[1.0, 0.0, -H / 2.0],
                       [0.0, 1.0, -W / 2.0],
                       [0.0, 0.0, 1.0]], jnp.float32)
    shift_inv = jnp.array([[1.0, 0.0, H / 2.0],
                           [0.0, 1.0, W / 2.0],
                           [0.0, 0.0, 1.0]], jnp.float32)
    A = shift_inv @ (A @ shift)                                      # (B, 3, 3)
    aff8 = jnp.concatenate([A[:, :2, :2].reshape(B, 4),              # a00,a01,a10,a11
                            A[:, :2, 2],                             # t0,t1
                            jnp.zeros((B, 2), jnp.float32)], axis=1) # pad to 8
    aff8 = aff8.astype(jnp.float32)

    # --- grid = lin @ diffeo_grid + off ; warped = grid_pull(image, grid, 'dct2') -
    img2 = image.reshape(B, C * H, W).astype(pull_matmul_dtype)      # bf16 pull matmul, f32 acc
    warped_flat, grid_flat = affine_pull(aff8, img2, u, H, W, HWp, C, T_pull)
    warped = warped_flat[..., :HW].reshape(B, C, H, W)
    grid = grid_flat[..., :HW].reshape(B, 2, H, W).transpose(0, 2, 3, 1)
    return warped, grid


if __name__ == "__main__":
    key = jax.random.PRNGKey(0)
    k_img, k_def = jax.random.split(key)
    image = jax.random.normal(k_img, (2, 4, 16, 16), jnp.float32)

    fn = jax.jit(lambda img, k: deformed_sample(img, k))
    warped, grid = fn(image, k_def)
    jax.block_until_ready((warped, grid))

    assert warped.shape == (2, 4, 16, 16), warped.shape
    assert grid.shape == (2, 16, 16, 2), grid.shape
    assert bool(jnp.all(jnp.isfinite(warped))) and bool(jnp.all(jnp.isfinite(grid)))
    print("KERNEL_OK")
</pallas_src>

<mosaic_0001>
module attributes {stable_mosaic.version = 11 : i64} {
  func.func @_smooth_kernel(%arg0: i32, %arg1: memref<16x16xf32, #tpu.memory_space<vmem>>, %arg2: memref<16x16xf32, #tpu.memory_space<vmem>>, %arg3: memref<1x16x16xf32, #tpu.memory_space<vmem>>, %arg4: memref<1x16x16xf32, #tpu.memory_space<vmem>>) attributes {dimension_semantics = [#tpu.dimension_semantics<parallel>], iteration_bounds = array<i64: 4>, scalar_prefetch = 0 : i64, scratch_operands = 0 : i64, tpu.core_type = #tpu.core_type<tc>, window_params = [{pipeline_mode = #tpu.pipeline_mode<synchronous>, transform_indices = @transform_0, window_bounds = array<i64: 16, 16>}, {pipeline_mode = #tpu.pipeline_mode<synchronous>, transform_indices = @transform_1, window_bounds = array<i64: 16, 16>}, {transform_indices = @transform_2, window_bounds = array<i64: 1, 16, 16>}, {transform_indices = @transform_3, window_bounds = array<i64: 1, 16, 16>}]} {
    %c0 = arith.constant 0 : index
    %c0_0 = arith.constant 0 : index
    %c0_1 = arith.constant 0 : index
    %0 = vector.load %arg3[%c0, %c0_0, %c0_1] : memref<1x16x16xf32, #tpu.memory_space<vmem>>, vector<1x16x16xf32>
    %1 = vector.shape_cast %0 : vector<1x16x16xf32> to vector<16x16xf32>
    %c0_2 = arith.constant 0 : index
    %c0_3 = arith.constant 0 : index
    %2 = vector.load %arg2[%c0_2, %c0_3] : memref<16x16xf32, #tpu.memory_space<vmem>>, vector<16x16xf32>
    %cst = arith.constant dense<0.000000e+00> : vector<16x16xf32>
    %3 = tpu.matmul %1, %2, %cst {dimension_numbers = #tpu.dot_dimension_numbers<[1], [0], [0], [1], [0, 0, 1, 1], [], []>} : vector<16x16xf32>, vector<16x16xf32>, vector<16x16xf32> -> vector<16x16xf32>
    %c0_4 = arith.constant 0 : index
    %c0_5 = arith.constant 0 : index
    %4 = vector.load %arg1[%c0_4, %c0_5] : memref<16x16xf32, #tpu.memory_space<vmem>>, vector<16x16xf32>
    %cst_6 = arith.constant dense<0.000000e+00> : vector<16x16xf32>
    %5 = tpu.matmul %4, %3, %cst_6 {dimension_numbers = #tpu.dot_dimension_numbers<[1], [0], [0], [1], [0, 0, 1, 1], [], []>} : vector<16x16xf32>, vector<16x16xf32>, vector<16x16xf32> -> vector<16x16xf32>
    %c0_7 = arith.constant 0 : index
    %c0_8 = arith.constant 0 : index
    %c0_9 = arith.constant 0 : index
    %6 = vector.load %arg4[%c0_7, %c0_8, %c0_9] : memref<1x16x16xf32, #tpu.memory_space<vmem>>, vector<1x16x16xf32>
    %7 = vector.shape_cast %6 : vector<1x16x16xf32> to vector<16x16xf32>
    %8 = vector.shape_cast %5 : vector<16x16xf32> to vector<1x16x16xf32>
    tpu.vector_store %arg4[%c0_7, %c0_8, %c0_9], %8 {strides = array<i32>} : memref<1x16x16xf32, #tpu.memory_space<vmem>>, vector<1x16x16xf32>,
    return
  }
  func.func @transform_0(%arg0: i32) -> (i32, i32) {
    %c0_i32 = arith.constant 0 : i32
    %c0_i32_0 = arith.constant 0 : i32
    %c0_i32_1 = arith.constant 0 : i32
    return %c0_i32, %c0_i32_0 : i32, i32
  }
  func.func @transform_1(%arg0: i32) -> (i32, i32) {
    %c0_i32 = arith.constant 0 : i32
    %c0_i32_0 = arith.constant 0 : i32
    %c0_i32_1 = arith.constant 0 : i32
    return %c0_i32, %c0_i32_0 : i32, i32
  }
  func.func @transform_2(%arg0: i32) -> (i32, i32, i32) {
    %c0_i32 = arith.constant 0 : i32
    %c0_i32_0 = arith.constant 0 : i32
    %c0_i32_1 = arith.constant 0 : i32
    return %arg0, %c0_i32, %c0_i32_0 : i32, i32, i32
  }
  func.func @transform_3(%arg0: i32) -> (i32, i32, i32) {
    %c0_i32 = arith.constant 0 : i32
    %c0_i32_0 = arith.constant 0 : i32
    %c0_i32_1 = arith.constant 0 : i32
    return %arg0, %c0_i32, %c0_i32_0 : i32, i32, i32
  }
}

module attributes {stable_mosaic.version = 11 : i64} {
  func.func @_exp_kernel(%arg0: i32, %arg1: memref<1x2x1x256xf32, #tpu.memory_space<vmem>>, %arg2: memref<1x2x1x256xf32, #tpu.memory_space<vmem>>, %arg3: memref<32x16xbf16, #tpu.memory_space<vmem>>) attributes {dimension_semantics = [#tpu.dimension_semantics<parallel>], iteration_bounds = array<i64: 2>, scalar_prefetch = 0 : i64, scratch_operands = 1 : i64, tpu.core_type = #tpu.core_type<tc>, window_params = [{transform_indices = @transform_0, window_bounds = array<i64: 1, 2, 1, 256>}, {transform_indices = @transform_1, window_bounds = array<i64: 1, 2, 1, 256>}]} {
    %c0 = arith.constant 0 : index
    %c0_0 = arith.constant 0 : index
    %c0_1 = arith.constant 0 : index
    %c0_2 = arith.constant 0 : index
    %0 = vector.load %arg1[%c0, %c0_0, %c0_1, %c0_2] : memref<1x2x1x256xf32, #tpu.memory_space<vmem>>, vector<1x2x1x256xf32>
    %cst = arith.constant 3.906250e-03 : f32
    %1 = vector.broadcast %cst : f32 to vector<1x2x1x256xf32>
    %2 = arith.mulf %0, %1 : vector<1x2x1x256xf32>
    %c0_3 = arith.constant 0 : index
    %c0_4 = arith.constant 0 : index
    %c0_5 = arith.constant 0 : index
    %c0_6 = arith.constant 0 : index
    %3 = vector.load %arg2[%c0_3, %c0_4, %c0_5, %c0_6] : memref<1x2x1x256xf32, #tpu.memory_space<vmem>>, vector<1x2x1x256xf32>
    tpu.vector_store %arg2[%c0_3, %c0_4, %c0_5, %c0_6], %2 {strides = array<i32>} : memref<1x2x1x256xf32, #tpu.memory_space<vmem>>, vector<1x2x1x256xf32>,
    %c0_i32 = arith.constant 0 : i32
    %c8_i32 = arith.constant 8 : i32
    %4 = arith.addi %c0_i32, %c8_i32 : i32
    %c1_i32 = arith.constant 1 : i32
    scf.for %arg4 = %c0_i32 to %4 step %c1_i32  : i32 {
      %c0_7 = arith.constant 0 : index
      %c0_8 = arith.constant 0 : index
      %c0_9 = arith.constant 0 : index
      %c0_10 = arith.constant 0 : index
      %5 = vector.load %arg2[%c0_7, %c0_8, %c0_9, %c0_10] : memref<1x2x1x256xf32, #tpu.memory_space<vmem>>, vector<1x1x1x16xf32>
      %6 = vector.shape_cast %5 : vector<1x1x1x16xf32> to vector<1x16xf32>
      %7 = arith.truncf %6 : vector<1x16xf32> to vector<1x16xbf16>
      %c0_11 = arith.constant 0 : index
      %c0_12 = arith.constant 0 : index
      %8 = vector.load %arg3[%c0_11, %c0_12] : memref<32x16xbf16, #tpu.memory_space<vmem>>, vector<1x16xbf16>
      tpu.vector_store %arg3[%c0_11, %c0_12], %7 {strides = array<i32>} : memref<32x16xbf16, #tpu.memory_space<vmem>>, vector<1x16xbf16>,
      %c0_13 = arith.constant 0 : index
      %c1 = arith.constant 1 : index
      %c0_14 = arith.constant 0 : index
      %c0_15 = arith.constant 0 : index
      %9 = vector.load %arg2[%c0_13, %c1, %c0_14, %c0_15] : memref<1x2x1x256xf32, #tpu.memory_space<vmem>>, vector<1x1x1x16xf32>
      %10 = vector.shape_cast %9 : vector<1x1x1x16xf32> to vector<1x16xf32>
      %11 = arith.truncf %10 : vector<1x16xf32> to vector<1x16xbf16>
      %c16 = arith.constant 16 : index
      %c0_16 = arith.constant 0 : index
      %12 = vector.load %arg3[%c16, %c0_16] : memref<32x16xbf16, #tpu.memory_space<vmem>>, vector<1x16xbf16>
      tpu.vector_store %arg3[%c16, %c0_16], %11 {strides = array<i32>} : memref<32x16xbf16, #tpu.memory_space<vmem>>, vector<1x16xbf16>,
      %c0_17 = arith.constant 0 : index
      %c0_18 = arith.constant 0 : index
      %c0_19 = arith.constant 0 : index
      %c16_20 = arith.constant 16 : index
      %13 = vector.load %arg2[%c0_17, %c0_18, %c0_19, %c16_20] : memref<1x2x1x256xf32, #tpu.memory_space<vmem>>, vector<1x1x1x16xf32>
      %14 = vector.shape_cast %13 : vector<1x1x1x16xf32> to vector<1x16xf32>
      %15 = arith.truncf %14 : vector<1x16xf32> to vector<1x16xbf16>
      %c1_21 = arith.constant 1 : index
      %c0_22 = arith.constant 0 : index
      %16 = vector.load %arg3[%c1_21, %c0_22] : memref<32x16xbf16, #tpu.memory_space<vmem>>, vector<1x16xbf16>
      tpu.vector_store %arg3[%c1_21, %c0_22], %15 {strides = array<i32>} : memref<32x16xbf16, #tpu.memory_space<vmem>>, vector<1x16xbf16>,
      %c0_23 = arith.constant 0 : index
      %c1_24 = arith.constant 1 : index
      %c0_25 = arith.constant 0 : index
      %c16_26 = arith.constant 16 : index
      %17 = vector.load %arg2[%c0_23, %c1_24, %c0_25, %c16_26] : memref<1x2x1x256xf32, #tpu.memory_space<vmem>>, vector<1x1x1x16xf32>
      %18 = vector.shape_cast %17 : vector<1x1x1x16xf32> to vector<1x16xf32>
      %19 = arith.truncf %18 : vector<1x16xf32> to vector<1x16xbf16>
      %c17 = arith.constant 17 : index
      %c0_27 = arith.constant 0 : index
      %20 = vector.load %arg3[%c17, %c0_27] : memref<32x16xbf16, #tpu.memory_space<vmem>>, vector<1x16xbf16>
      tpu.vector_store %arg3[%c17, %c0_27], %19 {strides = array<i32>} : memref<32x16xbf16, #tpu.memory_space<vmem>>, vector<1x16xbf16>,
      %c0_28 = arith.constant 0 : index
      %c0_29 = arith.constant 0 : index
      %c0_30 = arith.constant 0 : index
      %c32 = arith.constant 32 : index
      %21 = vector.load %arg2[%c0_28, %c0_29, %c0_30, %c32] : memref<1x2x1x256xf32, #tpu.memory_space<vmem>>, vector<1x1x1x16xf32>
      %22 = vector.shape_cast %21 : vector<1x1x1x16xf32> to vector<1x16xf32>
      %23 = arith.truncf %22 : vector<1x16xf32> to vector<1x16xbf16>
      %c2 = arith.constant 2 : index
      %c0_31 = arith.constant 0 : index
      %24 = vector.load %arg3[%c2, %c0_31] : memref<32x16xbf16, #tpu.memory_space<vmem>>, vector<1x16xbf16>
      tpu.vector_store %arg3[%c2, %c0_31], %23 {strides = array<i32>} : memref<32x16xbf16, #tpu.memory_space<vmem>>, vector<1x16xbf16>,
      %c0_32 = arith.constant 0 : index
      %c1_33 = arith.constant 1 : index
      %c0_34 = arith.constant 0 : index
      %c32_35 = arith.constant 32 : index
      %25 = vector.load %arg2[%c0_32, %c1_33, %c0_34, %c32_35] : memref<1x2x1x256xf32, #tpu.memory_space<vmem>>, vector<1x1x1x16xf32>
      %26 = vector.shape_cast %25 : vector<1x1x1x16xf32> to vector<1x16xf32>
      %27 = arith.truncf %26 : vector<1x16xf32> to vector<1x16xbf16>
      %c18 = arith.constant 18 : index
      %c0_36 = arith.constant 0 : index
      %28 = vector.load %arg3[%c18, %c0_36] : memref<32x16xbf16, #tpu.memory_space<vmem>>, vector<1x16xbf16>
      tpu.vector_store %arg3[%c18, %c0_36], %27 {strides = array<i32>} : memref<32x16xbf16, #tpu.memory_space<vmem>>, vector<1x16xbf16>,
      %c0_37 = arith.constant 0 : index
      %c0_38 = arith.constant 0 : index
      %c0_39 = arith.constant 0 : index
      %c48 = arith.constant 48 : index
      %29 = vector.load %arg2[%c0_37, %c0_38, %c0_39, %c48] : memref<1x2x1x256xf32, #tpu.memory_space<vmem>>, vector<1x1x1x16xf32>
      %30 = vector.shape_cast %29 : vector<1x1x1x16xf32> to vector<1x16xf32>
      %31 = arith.truncf %30 : vector<1x16xf32> to vector<1x16xbf16>
      %c3 = arith.constant 3 : index
      %c0_40 = arith.constant 0 : index
      %32 = vector.load %arg3[%c3, %c0_40] : memref<32x16xbf16, #tpu.memory_space<vmem>>, vector<1x16xbf16>
      tpu.vector_store %arg3[%c3, %c0_40], %31 {strides = array<i32>} : memref<32x16xbf16, #tpu.memory_space<vmem>>, vector<1x16xbf16>,
      %c0_41 = arith.constant 0 : index
      %c1_42 = arith.constant 1 : index
      %c0_43 = arith.constant 0 : index
      %c48_44 = arith.constant 48 : index
      %33 = vector.load %arg2[%c0_41, %c1_42, %c0_43, %c48_44] : memref<1x2x1x256xf32, #tpu.memory_space<vmem>>, vector<1x1x1x16xf32>
      %34 = vector.shape_cast %33 : vector<1x1x1x16xf32> to vector<1x16xf32>
      %35 = arith.truncf %34 : vector<1x16xf32> to vector<1x16xbf16>
      %c19 = arith.constant 19 : index
      %c0_45 = arith.constant 0 : index
      %36 = vector.load %arg3[%c19, %c0_45] : memref<32x16xbf16, #tpu.memory_space<vmem>>, vector<1x16xbf16>
      tpu.vector_store %arg3[%c19, %c0_45], %35 {strides = array<i32>} : memref<32x16xbf16, #tpu.memory_space<vmem>>, vector<1x16xbf16>,
      %c0_46 = arith.constant 0 : index
      %c0_47 = arith.constant 0 : index
      %c0_48 = arith.constant 0 : index
      %c64 = arith.constant 64 : index
      %37 = vector.load %arg2[%c0_46, %c0_47, %c0_48, %c64] : memref<1x2x1x256xf32, #tpu.memory_space<vmem>>, vector<1x1x1x16xf32>
      %38 = vector.shape_cast %37 : vector<1x1x1x16xf32> to vector<1x16xf32>
      %39 = arith.truncf %38 : vector<1x16xf32> to vector<1x16xbf16>
      %c4 = arith.constant 4 : index
      %c0_49 = arith.constant 0 : index
      %40 = vector.load %arg3[%c4, %c0_49] : memref<32x16xbf16, #tpu.memory_space<vmem>>, vector<1x16xbf16>
      tpu.vector_store %arg3[%c4, %c0_49], %39 {strides = array<i32>} : memref<32x16xbf16, #tpu.memory_space<vmem>>, vector<1x16xbf16>,
      %c0_50 = arith.constant 0 : index
      %c1_51 = arith.constant 1 : index
      %c0_52 = arith.constant 0 : index
      %c64_53 = arith.constant 64 : index
      %41 = vector.load %arg2[%c0_50, %c1_51, %c0_52, %c64_53] : memref<1x2x1x256xf32, #tpu.memory_space<vmem>>, vector<1x1x1x16xf32>
      %42 = vector.shape_cast %41 : vector<1x1x1x16xf32> to vector<1x16xf32>
      %43 = arith.truncf %42 : vector<1x16xf32> to vector<1x16xbf16>
      %c20 = arith.constant 20 : index
      %c0_54 = arith.constant 0 : index
      %44 = vector.load %arg3[%c20, %c0_54] : memref<32x16xbf16, #tpu.memory_space<vmem>>, vector<1x16xbf16>
      tpu.vector_store %arg3[%c20, %c0_54], %43 {strides = array<i32>} : memref<32x16xbf16, #tpu.memory_space<vmem>>, vector<1x16xbf16>,
      %c0_55 = arith.constant 0 : index
      %c0_56 = arith.constant 0 : index
      %c0_57 = arith.constant 0 : index
      %c80 = arith.constant 80 : index
      %45 = vector.load %arg2[%c0_55, %c0_56, %c0_57, %c80] : memref<1x2x1x256xf32, #tpu.memory_space<vmem>>, vector<1x1x1x16xf32>
      %46 = vector.shape_cast %45 : vector<1x1x1x16xf32> to vector<1x16xf32>
      %47 = arith.truncf %46 : vector<1x16xf32> to vector<1x16xbf16>
      %c5 = arith.constant 5 : index
      %c0_58 = arith.constant 0 : index
      %48 = vector.load %arg3[%c5, %c0_58] : memref<32x16xbf16, #tpu.memory_space<vmem>>, vector<1x16xbf16>
      tpu.vector_store %arg3[%c5, %c0_58], %47 {strides = array<i32>} : memref<32x16xbf16, #tpu.memory_space<vmem>>, vector<1x16xbf16>,
      %c0_59 = arith.constant 0 : index
      %c1_60 = arith.constant 1 : index
      %c0_61 = arith.constant 0 : index
      %c80_62 = arith.constant 80 : index
      %49 = vector.load %arg2[%c0_59, %c1_60, %c0_61, %c80_62] : memref<1x2x1x256xf32, #tpu.memory_space<vmem>>, vector<1x1x1x16xf32>
      %50 = vector.shape_cast %49 : vector<1x1x1x16xf32> to vector<1x16xf32>
      %51 = arith.truncf %50 : vector<1x16xf32> to vector<1x16xbf16>
      %c21 = arith.constant 21 : index
      %c0_63 = arith.constant 0 : index
      %52 = vector.load %arg3[%c21, %c0_63] : memref<32x16xbf16, #tpu.memory_space<vmem>>, vector<1x16xbf16>
      tpu.vector_store %arg3[%c21, %c0_63], %51 {strides = array<i32>} : memref<32x16xbf16, #tpu.memory_space<vmem>>, vector<1x16xbf16>,
      %c0_64 = arith.constant 0 : index
      %c0_65 = arith.constant 0 : index
      %c0_66 = arith.constant 0 : index
      %c96 = arith.constant 96 : index
      %53 = vector.load %arg2[%c0_64, %c0_65, %c0_66, %c96] : memref<1x2x1x256xf32, #tpu.memory_space<vmem>>, vector<1x1x1x16xf32>
      %54 = vector.shape_cast %53 : vector<1x1x1x16xf32> to vector<1x16xf32>
      %55 = arith.truncf %54 : vector<1x16xf32> to vector<1x16xbf16>
      %c6 = arith.constant 6 : index
      %c0_67 = arith.constant 0 : index
      %56 = vector.load %arg3[%c6, %c0_67] : memref<32x16xbf16, #tpu.memory_space<vmem>>, vector<1x16xbf16>
      tpu.vector_store %arg3[%c6, %c0_67], %55 {strides = array<i32>} : memref<32x16xbf16, #tpu.memory_space<vmem>>, vector<1x16xbf16>,
      %c0_68 = arith.constant 0 : index
      %c1_69 = arith.constant 1 : index
      %c0_70 = arith.constant 0 : index
      %c96_71 = arith.constant 96 : index
      %57 = vector.load %arg2[%c0_68, %c1_69, %c0_70, %c96_71] : memref<1x2x1x256xf32, #tpu.memory_space<vmem>>, vector<1x1x1x16xf32>
      %58 = vector.shape_cast %57 : vector<1x1x1x16xf32> to vector<1x16xf32>
      %59 = arith.truncf %58 : vector<1x16xf32> to vector<1x16xbf16>
      %c22 = arith.constant 22 : index
      %c0_72 = arith.constant 0 : index
      %60 = vector.load %arg3[%c22, %c0_72] : memref<32x16xbf16, #tpu.memory_space<vmem>>, vector<1x16xbf16>
      tpu.vector_store %arg3[%c22, %c0_72], %59 {strides = array<i32>} : memref<32x16xbf16, #tpu.memory_space<vmem>>, vector<1x16xbf16>,
      %c0_73 = arith.constant 0 : index
      %c0_74 = arith.constant 0 : index
      %c0_75 = arith.constant 0 : index
      %c112 = arith.constant 112 : index
      %61 = vector.load %arg2[%c0_73, %c0_74, %c0_75, %c112] : memref<1x2x1x256xf32, #tpu.memory_space<vmem>>, vector<1x1x1x16xf32>
      %62 = vector.shape_cast %61 : vector<1x1x1x16xf32> to vector<1x16xf32>
      %63 = arith.truncf %62 : vector<1x16xf32> to vector<1x16xbf16>
      %c7 = arith.constant 7 : index
      %c0_76 = arith.constant 0 : index
      %64 = vector.load %arg3[%c7, %c0_76] : memref<32x16xbf16, #tpu.memory_space<vmem>>, vector<1x16xbf16>
      tpu.vector_store %arg3[%c7, %c0_76], %63 {strides = array<i32>} : memref<32x16xbf16, #tpu.memory_space<vmem>>, vector<1x16xbf16>,
      %c0_77 = arith.constant 0 : index
      %c1_78 = arith.constant 1 : index
      %c0_79 = arith.constant 0 : index
      %c112_80 = arith.constant 112 : index
      %65 = vector.load %arg2[%c0_77, %c1_78, %c0_79, %c112_80] : memref<1x2x1x256xf32, #tpu.memory_space<vmem>>, vector<1x1x1x16xf32>
      %66 = vector.shape_cast %65 : vector<1x1x1x16xf32> to vector<1x16xf32>
      %67 = arith.truncf %66 : vector<1x16xf32> to vector<1x16xbf16>
      %c23 = arith.constant 23 : index
      %c0_81 = arith.constant 0 : index
      %68 = vector.load %arg3[%c23, %c0_81] : memref<32x16xbf16, #tpu.memory_space<vmem>>, vector<1x16xbf16>
      tpu.vector_store %arg3[%c23, %c0_81], %67 {strides = array<i32>} : memref<32x16xbf16, #tpu.memory_space<vmem>>, vector<1x16xbf16>,
      %c0_82 = arith.constant 0 : index
      %c0_83 = arith.constant 0 : index
      %c0_84 = arith.constant 0 : index
      %c128 = arith.constant 128 : index
      %69 = vector.load %arg2[%c0_82, %c0_83, %c0_84, %c128] : memref<1x2x1x256xf32, #tpu.memory_space<vmem>>, vector<1x1x1x16xf32>
      %70 = vector.shape_cast %69 : vector<1x1x1x16xf32> to vector<1x16xf32>
      %71 = arith.truncf %70 : vector<1x16xf32> to vector<1x16xbf16>
      %c8 = arith.constant 8 : index
      %c0_85 = arith.constant 0 : index
      %72 = vector.load %arg3[%c8, %c0_85] : memref<32x16xbf16, #tpu.memory_space<vmem>>, vector<1x16xbf16>
      tpu.vector_store %arg3[%c8, %c0_85], %71 {strides = array<i32>} : memref<32x16xbf16, #tpu.memory_space<vmem>>, vector<1x16xbf16>,
      %c0_86 = arith.constant 0 : index
      %c1_87 = arith.constant 1 : index
      %c0_88 = arith.constant 0 : index
      %c128_89 = arith.constant 128 : index
      %73 = vector.load %arg2[%c0_86, %c1_87, %c0_88, %c128_89] : memref<1x2x1x256xf32, #tpu.memory_space<vmem>>, vector<1x1x1x16xf32>
      %74 = vector.shape_cast %73 : vector<1x1x1x16xf32> to vector<1x16xf32>
      %75 = arith.truncf %74 : vector<1x16xf32> to vector<1x16xbf16>
      %c24 = arith.constant 24 : index
      %c0_90 = arith.constant 0 : index
      %76 = vector.load %arg3[%c24, %c0_90] : memref<32x16xbf16, #tpu.memory_space<vmem>>, vector<1x16xbf16>
      tpu.vector_store %arg3[%c24, %c0_90], %75 {strides = array<i32>} : memref<32x16xbf16, #tpu.memory_space<vmem>>, vector<1x16xbf16>,
      %c0_91 = arith.constant 0 : index
      %c0_92 = arith.constant 0 : index
      %c0_93 = arith.constant 0 : index
      %c144 = arith.constant 144 : index
      %77 = vector.load %arg2[%c0_91, %c0_92, %c0_93, %c144] : memref<1x2x1x256xf32, #tpu.memory_space<vmem>>, vector<1x1x1x16xf32>
      %78 = vector.shape_cast %77 : vector<1x1x1x16xf32> to vector<1x16xf32>
      %79 = arith.truncf %78 : vector<1x16xf32> to vector<1x16xbf16>
      %c9 = arith.constant 9 : index
      %c0_94 = arith.constant 0 : index
      %80 = vector.load %arg3[%c9, %c0_94] : memref<32x16xbf16, #tpu.memory_space<vmem>>, vector<1x16xbf16>
      tpu.vector_store %arg3[%c9, %c0_94], %79 {strides = array<i32>} : memref<32x16xbf16, #tpu.memory_space<vmem>>, vector<1x16xbf16>,
      %c0_95 = arith.constant 0 : index
      %c1_96 = arith.constant 1 : index
      %c0_97 = arith.constant 0 : index
      %c144_98 = arith.constant 144 : index
      %81 = vector.load %arg2[%c0_95, %c1_96, %c0_97, %c144_98] : memref<1x2x1x256xf32, #tpu.memory_space<vmem>>, vector<1x1x1x16xf32>
      %82 = vector.shape_cast %81 : vector<1x1x1x16xf32> to vector<1x16xf32>
      %83 = arith.truncf %82 : vector<1x16xf32> to vector<1x16xbf16>
      %c25 = arith.constant 25 : index
      %c0_99 = arith.constant 0 : index
      %84 = vector.load %arg3[%c25, %c0_99] : memref<32x16xbf16, #tpu.memory_space<vmem>>, vector<1x16xbf16>
      tpu.vector_store %arg3[%c25, %c0_99], %83 {strides = array<i32>} : memref<32x16xbf16, #tpu.memory_space<vmem>>, vector<1x16xbf16>,
      %c0_100 = arith.constant 0 : index
      %c0_101 = arith.constant 0 : index
      %c0_102 = arith.constant 0 : index
      %c160 = arith.constant 160 : index
      %85 = vector.load %arg2[%c0_100, %c0_101, %c0_102, %c160] : memref<1x2x1x256xf32, #tpu.memory_space<vmem>>, vector<1x1x1x16xf32>
      %86 = vector.shape_cast %85 : vector<1x1x1x16xf32> to vector<1x16xf32>
      %87 = arith.truncf %86 : vector<1x16xf32> to vector<1x16xbf16>
      %c10 = arith.constant 10 : index
      %c0_103 = arith.constant 0 : index
      %88 = vector.load %arg3[%c10, %c0_103] : memref<32x16xbf16, #tpu.memory_space<vmem>>, vector<1x16xbf16>
      tpu.vector_store %arg3[%c10, %c0_103], %87 {strides = array<i32>} : memref<32x16xbf16, #tpu.memory_space<vmem>>, vector<1x16xbf16>,
      %c0_104 = arith.constant 0 : index
      %c1_105 = arith.constant 1 : index
      %c0_106 = arith.constant 0 : index
      %c160_107 = arith.constant 160 : index
      %89 = vector.load %arg2[%c0_104, %c1_105, %c0_106, %c160_107] : memref<1x2x1x256xf32, #tpu.memory_space<vmem>>, vector<1x1x1x16xf32>
      %90 = vector.shape_cast %89 : vector<1x1x1x16xf32> to vector<1x16xf32>
      %91 = arith.truncf %90 : vector<1x16xf32> to vector<1x16xbf16>
      %c26 = arith.constant 26 : index
      %c0_108 = arith.constant 0 : index
      %92 = vector.load %arg3[%c26, %c0_108] : memref<32x16xbf16, #tpu.memory_space<vmem>>, vector<1x16xbf16>
      tpu.vector_store %arg3[%c26, %c0_108], %91 {strides = array<i32>} : memref<32x16xbf16, #tpu.memory_space<vmem>>, vector<1x16xbf16>,
      %c0_109 = arith.constant 0 : index
      %c0_110 = arith.constant 0 : index
      %c0_111 = arith.constant 0 : index
      %c176 = arith.constant 176 : index
      %93 = vector.load %arg2[%c0_109, %c0_110, %c0_111, %c176] : memref<1x2x1x256xf32, #tpu.memory_space<vmem>>, vector<1x1x1x16xf32>
      %94 = vector.shape_cast %93 : vector<1x1x1x16xf32> to vector<1x16xf32>
      %95 = arith.truncf %94 : vector<1x16xf32> to vector<1x16xbf16>
      %c11 = arith.constant 11 : index
      %c0_112 = arith.constant 0 : index
      %96 = vector.load %arg3[%c11, %c0_112] : memref<32x16xbf16, #tpu.memory_space<vmem>>, vector<1x16xbf16>
      tpu.vector_store %arg3[%c11, %c0_112], %95 {strides = array<i32>} : memref<32x16xbf16, #tpu.memory_space<vmem>>, vector<1x16xbf16>,
      %c0_113 = arith.constant 0 : index
      %c1_114 = arith.constant 1 : index
      %c0_115 = arith.constant 0 : index
      %c176_116 = arith.constant 176 : index
      %97 = vector.load %arg2[%c0_113, %c1_114, %c0_115, %c176_116] : memref<1x2x1x256xf32, #tpu.memory_space<vmem>>, vector<1x1x1x16xf32>
      %98 = vector.shape_cast %97 : vector<1x1x1x16xf32> to vector<1x16xf32>
      %99 = arith.truncf %98 : vector<1x16xf32> to vector<1x16xbf16>
      %c27 = arith.constant 27 : index
      %c0_117 = arith.constant 0 : index
      %100 = vector.load %arg3[%c27, %c0_117] : memref<32x16xbf16, #tpu.memory_space<vmem>>, vector<1x16xbf16>
      tpu.vector_store %arg3[%c27, %c0_117], %99 {strides = array<i32>} : memref<32x16xbf16, #tpu.memory_space<vmem>>, vector<1x16xbf16>,
      %c0_118 = arith.constant 0 : index
      %c0_119 = arith.constant 0 : index
      %c0_120 = arith.constant 0 : index
      %c192 = arith.constant 192 : index
      %101 = vector.load %arg2[%c0_118, %c0_119, %c0_120, %c192] : memref<1x2x1x256xf32, #tpu.memory_space<vmem>>, vector<1x1x1x16xf32>
      %102 = vector.shape_cast %101 : vector<1x1x1x16xf32> to vector<1x16xf32>
      %103 = arith.truncf %102 : vector<1x16xf32> to vector<1x16xbf16>
      %c12 = arith.constant 12 : index
      %c0_121 = arith.constant 0 : index
      %104 = vector.load %arg3[%c12, %c0_121] : memref<32x16xbf16, #tpu.memory_space<vmem>>, vector<1x16xbf16>
      tpu.vector_store %arg3[%c12, %c0_121], %103 {strides = array<i32>} : memref<32x16xbf16, #tpu.memory_space<vmem>>, vector<1x16xbf16>,
      %c0_122 = arith.constant 0 : index
      %c1_123 = arith.constant 1 : index
      %c0_124 = arith.constant 0 : index
      %c192_125 = arith.constant 192 : index
      %105 = vector.load %arg2[%c0_122, %c1_123, %c0_124, %c192_125] : memref<1x2x1x256xf32, #tpu.memory_space<vmem>>, vector<1x1x1x16xf32>
      %106 = vector.shape_cast %105 : vector<1x1x1x16xf32> to vector<1x16xf32>
      %107 = arith.truncf %106 : vector<1x16xf32> to vector<1x16xbf16>
      %c28 = arith.constant 28 : index
      %c0_126 = arith.constant 0 : index
      %108 = vector.load %arg3[%c28, %c0_126] : memref<32x16xbf16, #tpu.memory_space<vmem>>, vector<1x16xbf16>
      tpu.vector_store %arg3[%c28, %c0_126], %107 {strides = array<i32>} : memref<32x16xbf16, #tpu.memory_space<vmem>>, vector<1x16xbf16>,
      %c0_127 = arith.constant 0 : index
      %c0_128 = arith.constant 0 : index
      %c0_129 = arith.constant 0 : index
      %c208 = arith.constant 208 : index
      %109 = vector.load %arg2[%c0_127, %c0_128, %c0_129, %c208] : memref<1x2x1x256xf32, #tpu.memory_space<vmem>>, vector<1x1x1x16xf32>
      %110 = vector.shape_cast %109 : vector<1x1x1x16xf32> to vector<1x16xf32>
      %111 = arith.truncf %110 : vector<1x16xf32> to vector<1x16xbf16>
      %c13 = arith.constant 13 : index
      %c0_130 = arith.constant 0 : index
      %112 = vector.load %arg3[%c13, %c0_130] : memref<32x16xbf16, #tpu.memory_space<vmem>>, vector<1x16xbf16>
      tpu.vector_store %arg3[%c13, %c0_130], %111 {strides = array<i32>} : memref<32x16xbf16, #tpu.memory_space<vmem>>, vector<1x16xbf16>,
      %c0_131 = arith.constant 0 : index
      %c1_132 = arith.constant 1 : index
      %c0_133 = arith.constant 0 : index
      %c208_134 = arith.constant 208 : index
      %113 = vector.load %arg2[%c0_131, %c1_132, %c0_133, %c208_134] : memref<1x2x1x256xf32, #tpu.memory_space<vmem>>, vector<1x1x1x16xf32>
      %114 = vector.shape_cast %113 : vector<1x1x1x16xf32> to vector<1x16xf32>
      %115 = arith.truncf %114 : vector<1x16xf32> to vector<1x16xbf16>
      %c29 = arith.constant 29 : index
      %c0_135 = arith.constant 0 : index
      %116 = vector.load %arg3[%c29, %c0_135] : memref<32x16xbf16, #tpu.memory_space<vmem>>, vector<1x16xbf16>
      tpu.vector_store %arg3[%c29, %c0_135], %115 {strides = array<i32>} : memref<32x16xbf16, #tpu.memory_space<vmem>>, vector<1x16xbf16>,
      %c0_136 = arith.constant 0 : index
      %c0_137 = arith.constant 0 : index
      %c0_138 = arith.constant 0 : index
      %c224 = arith.constant 224 : index
      %117 = vector.load %arg2[%c0_136, %c0_137, %c0_138, %c224] : memref<1x2x1x256xf32, #tpu.memory_space<vmem>>, vector<1x1x1x16xf32>
      %118 = vector.shape_cast %117 : vector<1x1x1x16xf32> to vector<1x16xf32>
      %119 = arith.truncf %118 : vector<1x16xf32> to vector<1x16xbf16>
      %c14 = arith.constant 14 : index
      %c0_139 = arith.constant 0 : index
      %120 = vector.load %arg3[%c14, %c0_139] : memref<32x16xbf16, #tpu.memory_space<vmem>>, vector<1x16xbf16>
      tpu.vector_store %arg3[%c14, %c0_139], %119 {strides = array<i32>} : memref<32x16xbf16, #tpu.memory_space<vmem>>, vector<1x16xbf16>,
      %c0_140 = arith.constant 0 : index
      %c1_141 = arith.constant 1 : index
      %c0_142 = arith.constant 0 : index
      %c224_143 = arith.constant 224 : index
      %121 = vector.load %arg2[%c0_140, %c1_141, %c0_142, %c224_143] : memref<1x2x1x256xf32, #tpu.memory_space<vmem>>, vector<1x1x1x16xf32>
      %122 = vector.shape_cast %121 : vector<1x1x1x16xf32> to vector<1x16xf32>
      %123 = arith.truncf %122 : vector<1x16xf32> to vector<1x16xbf16>
      %c30 = arith.constant 30 : index
      %c0_144 = arith.constant 0 : index
      %124 = vector.load %arg3[%c30, %c0_144] : memref<32x16xbf16, #tpu.memory_space<vmem>>, vector<1x16xbf16>
      tpu.vector_store %arg3[%c30, %c0_144], %123 {strides = array<i32>} : memref<32x16xbf16, #tpu.memory_space<vmem>>, vector<1x16xbf16>,
      %c0_145 = arith.constant 0 : index
      %c0_146 = arith.constant 0 : index
      %c0_147 = arith.constant 0 : index
      %c240 = arith.constant 240 : index
      %125 = vector.load %arg2[%c0_145, %c0_146, %c0_147, %c240] : memref<1x2x1x256xf32, #tpu.memory_space<vmem>>, vector<1x1x1x16xf32>
      %126 = vector.shape_cast %125 : vector<1x1x1x16xf32> to vector<1x16xf32>
      %127 = arith.truncf %126 : vector<1x16xf32> to vector<1x16xbf16>
      %c15 = arith.constant 15 : index
      %c0_148 = arith.constant 0 : index
      %128 = vector.load %arg3[%c15, %c0_148] : memref<32x16xbf16, #tpu.memory_space<vmem>>, vector<1x16xbf16>
      tpu.vector_store %arg3[%c15, %c0_148], %127 {strides = array<i32>} : memref<32x16xbf16, #tpu.memory_space<vmem>>, vector<1x16xbf16>,
      %c0_149 = arith.constant 0 : index
      %c1_150 = arith.constant 1 : index
      %c0_151 = arith.constant 0 : index
      %c240_152 = arith.constant 240 : index
      %129 = vector.load %arg2[%c0_149, %c1_150, %c0_151, %c240_152] : memref<1x2x1x256xf32, #tpu.memory_space<vmem>>, vector<1x1x1x16xf32>
      %130 = vector.shape_cast %129 : vector<1x1x1x16xf32> to vector<1x16xf32>
      %131 = arith.truncf %130 : vector<1x16xf32> to vector<1x16xbf16>
      %c31 = arith.constant 31 : index
      %c0_153 = arith.constant 0 : index
      %132 = vector.load %arg3[%c31, %c0_153] : memref<32x16xbf16, #tpu.memory_space<vmem>>, vector<1x16xbf16>
      tpu.vector_store %arg3[%c31, %c0_153], %131 {strides = array<i32>} : memref<32x16xbf16, #tpu.memory_space<vmem>>, vector<1x16xbf16>,
      %133 = tpu.iota {dimensions = array<i32: 1>} : vector<1x256xi32>
      %c0_i32_154 = arith.constant 0 : i32
      %134 = vector.broadcast %c0_i32_154 : i32 to vector<1x256xi32>
      %135 = arith.addi %133, %134 : vector<1x256xi32>
      %136 = arith.sitofp %135 : vector<1x256xi32> to vector<1x256xf32>
      %cst_155 = arith.constant 5.000000e-01 : f32
      %137 = vector.broadcast %cst_155 : f32 to vector<1x256xf32>
      %138 = arith.addf %136, %137 : vector<1x256xf32>
      %cst_156 = arith.constant 6.250000e-02 : f32
      %139 = vector.broadcast %cst_156 : f32 to vector<1x256xf32>
      %140 = arith.mulf %138, %139 : vector<1x256xf32>
      %141 = math.floor %140 : vector<1x256xf32>
      %cst_157 = arith.constant 1.600000e+01 : f32
      %142 = vector.broadcast %cst_157 : f32 to vector<1x256xf32>
      %143 = arith.mulf %141, %142 : vector<1x256xf32>
      %144 = arith.subf %136, %143 : vector<1x256xf32>
      %c0_158 = arith.constant 0 : index
      %c0_159 = arith.constant 0 : index
      %c0_160 = arith.constant 0 : index
      %c0_161 = arith.constant 0 : index
      %145 = vector.load %arg2[%c0_158, %c0_159, %c0_160, %c0_161] : memref<1x2x1x256xf32, #tpu.memory_space<vmem>>, vector<1x1x1x256xf32>
      %146 = vector.shape_cast %145 : vector<1x1x1x256xf32> to vector<1x256xf32>
      %c0_162 = arith.constant 0 : index
      %c1_163 = arith.constant 1 : index
      %c0_164 = arith.constant 0 : index
      %c0_165 = arith.constant 0 : index
      %147 = vector.load %arg2[%c0_162, %c1_163, %c0_164, %c0_165] : memref<1x2x1x256xf32, #tpu.memory_space<vmem>>, vector<1x1x1x256xf32>
      %148 = vector.shape_cast %147 : vector<1x1x1x256xf32> to vector<1x256xf32>
      %149 = arith.addf %141, %146 : vector<1x256xf32>
      %150 = arith.addf %144, %148 : vector<1x256xf32>
      %151 = tpu.iota {dimensions = array<i32: 0>} : vector<16x256xi32>
      %152 = tpu.iota {dimensions = array<i32: 0>} : vector<16x256xi32>
      %153 = math.floor %149 : vector<1x256xf32>
      %154 = math.floor %150 : vector<1x256xf32>
      %155 = arith.subf %149, %153 : vector<1x256xf32>
      %cst_166 = arith.constant 1.000000e+00 : f32
      %156 = vector.broadcast %cst_166 : f32 to vector<1x256xf32>
      %157 = arith.subf %156, %155 : vector<1x256xf32>
      %158 = arith.subf %150, %154 : vector<1x256xf32>
      %cst_167 = arith.constant 1.000000e+00 : f32
      %159 = vector.broadcast %cst_167 : f32 to vector<1x256xf32>
      %160 = arith.subf %159, %158 : vector<1x256xf32>
      %cst_168 = arith.constant 6.250000e-02 : f32
      %161 = vector.broadcast %cst_168 : f32 to vector<1x256xf32>
      %162 = arith.mulf %153, %161 : vector<1x256xf32>
      %163 = math.floor %162 : vector<1x256xf32>
      %cst_169 = arith.constant 1.600000e+01 : f32
      %164 = vector.broadcast %cst_169 : f32 to vector<1x256xf32>
      %165 = arith.mulf %163, %164 : vector<1x256xf32>
      %166 = arith.subf %153, %165 : vector<1x256xf32>
      %cst_170 = arith.constant 0.000000e+00 : f32
      %cst_171 = arith.constant 1.500000e+01 : f32
      %167 = vector.broadcast %cst_170 : f32 to vector<1x256xf32>
      %168 = arith.maximumf %167, %166 : vector<1x256xf32>
      %169 = vector.broadcast %cst_171 : f32 to vector<1x256xf32>
      %170 = arith.minimumf %169, %168 : vector<1x256xf32>
      %cst_172 = arith.constant 5.000000e-01 : f32
      %171 = vector.broadcast %cst_172 : f32 to vector<1x256xf32>
      %172 = arith.addf %170, %171 : vector<1x256xf32>
      %173 = arith.fptosi %172 : vector<1x256xf32> to vector<1x256xi32>
      %cst_173 = arith.constant 1.000000e+00 : f32
      %174 = vector.broadcast %cst_173 : f32 to vector<1x256xf32>
      %175 = arith.addf %153, %174 : vector<1x256xf32>
      %cst_174 = arith.constant 6.250000e-02 : f32
      %176 = vector.broadcast %cst_174 : f32 to vector<1x256xf32>
      %177 = arith.mulf %175, %176 : vector<1x256xf32>
      %178 = math.floor %177 : vector<1x256xf32>
      %cst_175 = arith.constant 1.600000e+01 : f32
      %179 = vector.broadcast %cst_175 : f32 to vector<1x256xf32>
      %180 = arith.mulf %178, %179 : vector<1x256xf32>
      %181 = arith.subf %175, %180 : vector<1x256xf32>
      %cst_176 = arith.constant 0.000000e+00 : f32
      %cst_177 = arith.constant 1.500000e+01 : f32
      %182 = vector.broadcast %cst_176 : f32 to vector<1x256xf32>
      %183 = arith.maximumf %182, %181 : vector<1x256xf32>
      %184 = vector.broadcast %cst_177 : f32 to vector<1x256xf32>
      %185 = arith.minimumf %184, %183 : vector<1x256xf32>
      %cst_178 = arith.constant 5.000000e-01 : f32
      %186 = vector.broadcast %cst_178 : f32 to vector<1x256xf32>
      %187 = arith.addf %185, %186 : vector<1x256xf32>
      %188 = arith.fptosi %187 : vector<1x256xf32> to vector<1x256xi32>
      %cst_179 = arith.constant 6.250000e-02 : f32
      %189 = vector.broadcast %cst_179 : f32 to vector<1x256xf32>
      %190 = arith.mulf %154, %189 : vector<1x256xf32>
      %191 = math.floor %190 : vector<1x256xf32>
      %cst_180 = arith.constant 1.600000e+01 : f32
      %192 = vector.broadcast %cst_180 : f32 to vector<1x256xf32>
      %193 = arith.mulf %191, %192 : vector<1x256xf32>
      %194 = arith.subf %154, %193 : vector<1x256xf32>
      %cst_181 = arith.constant 0.000000e+00 : f32
      %cst_182 = arith.constant 1.500000e+01 : f32
      %195 = vector.broadcast %cst_181 : f32 to vector<1x256xf32>
      %196 = arith.maximumf %195, %194 : vector<1x256xf32>
      %197 = vector.broadcast %cst_182 : f32 to vector<1x256xf32>
      %198 = arith.minimumf %197, %196 : vector<1x256xf32>
      %cst_183 = arith.constant 5.000000e-01 : f32
      %199 = vector.broadcast %cst_183 : f32 to vector<1x256xf32>
      %200 = arith.addf %198, %199 : vector<1x256xf32>
      %201 = arith.fptosi %200 : vector<1x256xf32> to vector<1x256xi32>
      %cst_184 = arith.constant 1.000000e+00 : f32
      %202 = vector.broadcast %cst_184 : f32 to vector<1x256xf32>
      %203 = arith.addf %154, %202 : vector<1x256xf32>
      %cst_185 = arith.constant 6.250000e-02 : f32
      %204 = vector.broadcast %cst_185 : f32 to vector<1x256xf32>
      %205 = arith.mulf %203, %204 : vector<1x256xf32>
      %206 = math.floor %205 : vector<1x256xf32>
      %cst_186 = arith.constant 1.600000e+01 : f32
      %207 = vector.broadcast %cst_186 : f32 to vector<1x256xf32>
      %208 = arith.mulf %206, %207 : vector<1x256xf32>
      %209 = arith.subf %203, %208 : vector<1x256xf32>
      %cst_187 = arith.constant 0.000000e+00 : f32
      %cst_188 = arith.constant 1.500000e+01 : f32
      %210 = vector.broadcast %cst_187 : f32 to vector<1x256xf32>
      %211 = arith.maximumf %210, %209 : vector<1x256xf32>
      %212 = vector.broadcast %cst_188 : f32 to vector<1x256xf32>
      %213 = arith.minimumf %212, %211 : vector<1x256xf32>
      %cst_189 = arith.constant 5.000000e-01 : f32
      %214 = vector.broadcast %cst_189 : f32 to vector<1x256xf32>
      %215 = arith.addf %213, %214 : vector<1x256xf32>
      %216 = arith.fptosi %215 : vector<1x256xf32> to vector<1x256xi32>
      %217 = vector.broadcast %173 : vector<1x256xi32> to vector<16x256xi32>
      %218 = arith.cmpi eq, %151, %217 : vector<16x256xi32>
      %cst_190 = arith.constant 0.000000e+00 : f32
      %219 = vector.shape_cast %157 : vector<1x256xf32> to vector<1x256xf32>
      %220 = vector.broadcast %219 : vector<1x256xf32> to vector<16x256xf32>
      %221 = vector.broadcast %cst_190 : f32 to vector<16x256xf32>
      %222 = arith.select %218, %220, %221 : vector<16x256xi1>, vector<16x256xf32>
      %223 = vector.broadcast %188 : vector<1x256xi32> to vector<16x256xi32>
      %224 = arith.cmpi eq, %151, %223 : vector<16x256xi32>
      %cst_191 = arith.constant 0.000000e+00 : f32
      %225 = vector.shape_cast %155 : vector<1x256xf32> to vector<1x256xf32>
      %226 = vector.broadcast %225 : vector<1x256xf32> to vector<16x256xf32>
      %227 = vector.broadcast %cst_191 : f32 to vector<16x256xf32>
      %228 = arith.select %224, %226, %227 : vector<16x256xi1>, vector<16x256xf32>
      %229 = arith.addf %222, %228 : vector<16x256xf32>
      %230 = vector.broadcast %201 : vector<1x256xi32> to vector<16x256xi32>
      %231 = arith.cmpi eq, %152, %230 : vector<16x256xi32>
      %cst_192 = arith.constant 0.000000e+00 : f32
      %232 = vector.shape_cast %160 : vector<1x256xf32> to vector<1x256xf32>
      %233 = vector.broadcast %232 : vector<1x256xf32> to vector<16x256xf32>
      %234 = vector.broadcast %cst_192 : f32 to vector<16x256xf32>
      %235 = arith.select %231, %233, %234 : vector<16x256xi1>, vector<16x256xf32>
      %236 = vector.broadcast %216 : vector<1x256xi32> to vector<16x256xi32>
      %237 = arith.cmpi eq, %152, %236 : vector<16x256xi32>
      %cst_193 = arith.constant 0.000000e+00 : f32
      %238 = vector.shape_cast %158 : vector<1x256xf32> to vector<1x256xf32>
      %239 = vector.broadcast %238 : vector<1x256xf32> to vector<16x256xf32>
      %240 = vector.broadcast %cst_193 : f32 to vector<16x256xf32>
      %241 = arith.select %237, %239, %240 : vector<16x256xi1>, vector<16x256xf32>
      %242 = arith.addf %235, %241 : vector<16x256xf32>
      %c0_194 = arith.constant 0 : index
      %c0_195 = arith.constant 0 : index
      %243 = vector.load %arg3[%c0_194, %c0_195] : memref<32x16xbf16, #tpu.memory_space<vmem>>, vector<32x16xbf16>
      %244 = arith.truncf %242 : vector<16x256xf32> to vector<16x256xbf16>
      %cst_196 = arith.constant dense<0.000000e+00> : vector<32x256xf32>
      %245 = tpu.matmul %243, %244, %cst_196 {dimension_numbers = #tpu.dot_dimension_numbers<[1], [0], [0], [1], [0, 0, 1, 1], [], []>} : vector<32x16xbf16>, vector<16x256xbf16>, vector<32x256xf32> -> vector<32x256xf32>
      %246 = vector.extract_strided_slice %245 {offsets = [0, 0], sizes = [16, 256], strides = [1, 1]} : vector<32x256xf32> to vector<16x256xf32>
      %247 = arith.mulf %229, %246 : vector<16x256xf32>
      %cst_197 = arith.constant dense<0.000000e+00> : vector<256xf32>
      %248 = vector.multi_reduction <add>, %247, %cst_197 [0] : vector<16x256xf32> to vector<256xf32>
      %249 = vector.shape_cast %248 : vector<256xf32> to vector<1x256xf32>
      %250 = vector.extract_strided_slice %245 {offsets = [16, 0], sizes = [16, 256], strides = [1, 1]} : vector<32x256xf32> to vector<16x256xf32>
      %251 = arith.mulf %229, %250 : vector<16x256xf32>
      %cst_198 = arith.constant dense<0.000000e+00> : vector<256xf32>
      %252 = vector.multi_reduction <add>, %251, %cst_198 [0] : vector<16x256xf32> to vector<256xf32>
      %253 = vector.shape_cast %252 : vector<256xf32> to vector<1x256xf32>
      %254 = arith.addf %146, %249 : vector<1x256xf32>
      %c0_199 = arith.constant 0 : index
      %c0_200 = arith.constant 0 : index
      %c0_201 = arith.constant 0 : index
      %c0_202 = arith.constant 0 : index
      %255 = vector.load %arg2[%c0_199, %c0_200, %c0_201, %c0_202] : memref<1x2x1x256xf32, #tpu.memory_space<vmem>>, vector<1x1x1x256xf32>
      %256 = vector.shape_cast %255 : vector<1x1x1x256xf32> to vector<1x256xf32>
      %257 = vector.shape_cast %254 : vector<1x256xf32> to vector<1x1x1x256xf32>
      tpu.vector_store %arg2[%c0_199, %c0_200, %c0_201, %c0_202], %257 {strides = array<i32>} : memref<1x2x1x256xf32, #tpu.memory_space<vmem>>, vector<1x1x1x256xf32>,
      %258 = arith.addf %148, %253 : vector<1x256xf32>
      %c0_203 = arith.constant 0 : index
      %c1_204 = arith.constant 1 : index
      %c0_205 = arith.constant 0 : index
      %c0_206 = arith.constant 0 : index
      %259 = vector.load %arg2[%c0_203, %c1_204, %c0_205, %c0_206] : memref<1x2x1x256xf32, #tpu.memory_space<vmem>>, vector<1x1x1x256xf32>
      %260 = vector.shape_cast %259 : vector<1x1x1x256xf32> to vector<1x256xf32>
      %261 = vector.shape_cast %258 : vector<1x256xf32> to vector<1x1x1x256xf32>
      tpu.vector_store %arg2[%c0_203, %c1_204, %c0_205, %c0_206], %261 {strides = array<i32>} : memref<1x2x1x256xf32, #tpu.memory_space<vmem>>, vector<1x1x1x256xf32>,
    }
    return
  }
  func.func @transform_0(%arg0: i32) -> (i32, i32, i32, i32) {
    %c0_i32 = arith.constant 0 : i32
    %c0_i32_0 = arith.constant 0 : i32
    %c0_i32_1 = arith.constant 0 : i32
    %c0_i32_2 = arith.constant 0 : i32
    return %arg0, %c0_i32, %c0_i32_0, %c0_i32_1 : i32, i32, i32, i32
  }
  func.func @transform_1(%arg0: i32) -> (i32, i32, i32, i32) {
    %c0_i32 = arith.constant 0 : i32
    %c0_i32_0 = arith.constant 0 : i32
    %c0_i32_1 = arith.constant 0 : i32
    %c0_i32_2 = arith.constant 0 : i32
    return %arg0, %c0_i32, %c0_i32_0, %c0_i32_1 : i32, i32, i32, i32
  }
}

module attributes {stable_mosaic.version = 11 : i64} {
  func.func @_pull_kernel(%arg0: i32, %arg1: i32, %arg2: memref<2x8xf32, #tpu.memory_space<smem>>, %arg3: memref<1x64x16xbf16, #tpu.memory_space<vmem>>, %arg4: memref<1x2x256xf32, #tpu.memory_space<vmem>>, %arg5: memref<1x4x256xf32, #tpu.memory_space<vmem>>, %arg6: memref<1x2x256xf32, #tpu.memory_space<vmem>>) attributes {dimension_semantics = [#tpu.dimension_semantics<parallel>, #tpu.dimension_semantics<parallel>], iteration_bounds = array<i64: 2, 1>, scalar_prefetch = 0 : i64, scratch_operands = 0 : i64, tpu.core_type = #tpu.core_type<tc>, window_params = [{transform_indices = @transform_0, window_bounds = array<i64: 2, 8>}, {transform_indices = @transform_1, window_bounds = array<i64: 1, 64, 16>}, {transform_indices = @transform_2, window_bounds = array<i64: 1, 2, 256>}, {transform_indices = @transform_3, window_bounds = array<i64: 1, 4, 256>}, {transform_indices = @transform_4, window_bounds = array<i64: 1, 2, 256>}]} {
    %c256_i32 = arith.constant 256 : i32
    %0 = arith.muli %arg1, %c256_i32 : i32
    %1 = tpu.assume_multiple %0, 128 : i32
    %2 = tpu.iota {dimensions = array<i32: 1>} : vector<1x256xi32>
    %3 = vector.broadcast %1 : i32 to vector<1x256xi32>
    %4 = arith.addi %2, %3 : vector<1x256xi32>
    %5 = arith.sitofp %4 : vector<1x256xi32> to vector<1x256xf32>
    %cst = arith.constant 5.000000e-01 : f32
    %6 = vector.broadcast %cst : f32 to vector<1x256xf32>
    %7 = arith.addf %5, %6 : vector<1x256xf32>
    %cst_0 = arith.constant 6.250000e-02 : f32
    %8 = vector.broadcast %cst_0 : f32 to vector<1x256xf32>
    %9 = arith.mulf %7, %8 : vector<1x256xf32>
    %10 = math.floor %9 : vector<1x256xf32>
    %cst_1 = arith.constant 1.600000e+01 : f32
    %11 = vector.broadcast %cst_1 : f32 to vector<1x256xf32>
    %12 = arith.mulf %10, %11 : vector<1x256xf32>
    %13 = arith.subf %5, %12 : vector<1x256xf32>
    %c0 = arith.constant 0 : index
    %c0_2 = arith.constant 0 : index
    %c0_3 = arith.constant 0 : index
    %14 = vector.load %arg4[%c0, %c0_2, %c0_3] : memref<1x2x256xf32, #tpu.memory_space<vmem>>, vector<1x1x256xf32>
    %15 = vector.shape_cast %14 : vector<1x1x256xf32> to vector<1x256xf32>
    %16 = arith.addf %10, %15 : vector<1x256xf32>
    %c0_4 = arith.constant 0 : index
    %c1 = arith.constant 1 : index
    %c0_5 = arith.constant 0 : index
    %17 = vector.load %arg4[%c0_4, %c1, %c0_5] : memref<1x2x256xf32, #tpu.memory_space<vmem>>, vector<1x1x256xf32>
    %18 = vector.shape_cast %17 : vector<1x1x256xf32> to vector<1x256xf32>
    %19 = arith.addf %13, %18 : vector<1x256xf32>
    %20 = arith.index_cast %arg0 : i32 to index
    %c0_6 = arith.constant 0 : index
    %21 = memref.load %arg2[%20, %c0_6] : memref<2x8xf32, #tpu.memory_space<smem>>
    %22 = arith.index_cast %arg0 : i32 to index
    %c1_7 = arith.constant 1 : index
    %23 = memref.load %arg2[%22, %c1_7] : memref<2x8xf32, #tpu.memory_space<smem>>
    %24 = arith.index_cast %arg0 : i32 to index
    %c2 = arith.constant 2 : index
    %25 = memref.load %arg2[%24, %c2] : memref<2x8xf32, #tpu.memory_space<smem>>
    %26 = arith.index_cast %arg0 : i32 to index
    %c3 = arith.constant 3 : index
    %27 = memref.load %arg2[%26, %c3] : memref<2x8xf32, #tpu.memory_space<smem>>
    %28 = arith.index_cast %arg0 : i32 to index
    %c4 = arith.constant 4 : index
    %29 = memref.load %arg2[%28, %c4] : memref<2x8xf32, #tpu.memory_space<smem>>
    %30 = arith.index_cast %arg0 : i32 to index
    %c5 = arith.constant 5 : index
    %31 = memref.load %arg2[%30, %c5] : memref<2x8xf32, #tpu.memory_space<smem>>
    %32 = vector.broadcast %21 : f32 to vector<1x256xf32>
    %33 = arith.mulf %32, %16 : vector<1x256xf32>
    %34 = vector.broadcast %23 : f32 to vector<1x256xf32>
    %35 = arith.mulf %34, %19 : vector<1x256xf32>
    %36 = arith.addf %33, %35 : vector<1x256xf32>
    %37 = vector.broadcast %29 : f32 to vector<1x256xf32>
    %38 = arith.addf %36, %37 : vector<1x256xf32>
    %39 = vector.broadcast %25 : f32 to vector<1x256xf32>
    %40 = arith.mulf %39, %16 : vector<1x256xf32>
    %41 = vector.broadcast %27 : f32 to vector<1x256xf32>
    %42 = arith.mulf %41, %19 : vector<1x256xf32>
    %43 = arith.addf %40, %42 : vector<1x256xf32>
    %44 = vector.broadcast %31 : f32 to vector<1x256xf32>
    %45 = arith.addf %43, %44 : vector<1x256xf32>
    %c0_8 = arith.constant 0 : index
    %c0_9 = arith.constant 0 : index
    %c0_10 = arith.constant 0 : index
    %46 = vector.load %arg6[%c0_8, %c0_9, %c0_10] : memref<1x2x256xf32, #tpu.memory_space<vmem>>, vector<1x1x256xf32>
    %47 = vector.shape_cast %46 : vector<1x1x256xf32> to vector<1x256xf32>
    %48 = vector.shape_cast %38 : vector<1x256xf32> to vector<1x1x256xf32>
    tpu.vector_store %arg6[%c0_8, %c0_9, %c0_10], %48 {strides = array<i32>} : memref<1x2x256xf32, #tpu.memory_space<vmem>>, vector<1x1x256xf32>,
    %c0_11 = arith.constant 0 : index
    %c1_12 = arith.constant 1 : index
    %c0_13 = arith.constant 0 : index
    %49 = vector.load %arg6[%c0_11, %c1_12, %c0_13] : memref<1x2x256xf32, #tpu.memory_space<vmem>>, vector<1x1x256xf32>
    %50 = vector.shape_cast %49 : vector<1x1x256xf32> to vector<1x256xf32>
    %51 = vector.shape_cast %45 : vector<1x256xf32> to vector<1x1x256xf32>
    tpu.vector_store %arg6[%c0_11, %c1_12, %c0_13], %51 {strides = array<i32>} : memref<1x2x256xf32, #tpu.memory_space<vmem>>, vector<1x1x256xf32>,
    %52 = tpu.iota {dimensions = array<i32: 0>} : vector<16x256xi32>
    %53 = tpu.iota {dimensions = array<i32: 0>} : vector<16x256xi32>
    %54 = math.floor %38 : vector<1x256xf32>
    %55 = math.floor %45 : vector<1x256xf32>
    %56 = arith.subf %38, %54 : vector<1x256xf32>
    %cst_14 = arith.constant 1.000000e+00 : f32
    %57 = vector.broadcast %cst_14 : f32 to vector<1x256xf32>
    %58 = arith.subf %57, %56 : vector<1x256xf32>
    %59 = arith.subf %45, %55 : vector<1x256xf32>
    %cst_15 = arith.constant 1.000000e+00 : f32
    %60 = vector.broadcast %cst_15 : f32 to vector<1x256xf32>
    %61 = arith.subf %60, %59 : vector<1x256xf32>
    %cst_16 = arith.constant 3.125000e-02 : f32
    %62 = vector.broadcast %cst_16 : f32 to vector<1x256xf32>
    %63 = arith.mulf %54, %62 : vector<1x256xf32>
    %64 = math.floor %63 : vector<1x256xf32>
    %cst_17 = arith.constant 3.200000e+01 : f32
    %65 = vector.broadcast %cst_17 : f32 to vector<1x256xf32>
    %66 = arith.mulf %64, %65 : vector<1x256xf32>
    %67 = arith.subf %54, %66 : vector<1x256xf32>
    %cst_18 = arith.constant 0.000000e+00 : f32
    %cst_19 = arith.constant 3.100000e+01 : f32
    %68 = vector.broadcast %cst_18 : f32 to vector<1x256xf32>
    %69 = arith.maximumf %68, %67 : vector<1x256xf32>
    %70 = vector.broadcast %cst_19 : f32 to vector<1x256xf32>
    %71 = arith.minimumf %70, %69 : vector<1x256xf32>
    %cst_20 = arith.constant 1.600000e+01 : f32
    %72 = vector.broadcast %cst_20 : f32 to vector<1x256xf32>
    %73 = arith.cmpf oge, %71, %72 : vector<1x256xf32>
    %cst_21 = arith.constant 3.100000e+01 : f32
    %74 = vector.broadcast %cst_21 : f32 to vector<1x256xf32>
    %75 = arith.subf %74, %71 : vector<1x256xf32>
    %76 = arith.select %73, %75, %71 : vector<1x256xi1>, vector<1x256xf32>
    %cst_22 = arith.constant 0.000000e+00 : f32
    %cst_23 = arith.constant 1.500000e+01 : f32
    %77 = vector.broadcast %cst_22 : f32 to vector<1x256xf32>
    %78 = arith.maximumf %77, %76 : vector<1x256xf32>
    %79 = vector.broadcast %cst_23 : f32 to vector<1x256xf32>
    %80 = arith.minimumf %79, %78 : vector<1x256xf32>
    %cst_24 = arith.constant 5.000000e-01 : f32
    %81 = vector.broadcast %cst_24 : f32 to vector<1x256xf32>
    %82 = arith.addf %80, %81 : vector<1x256xf32>
    %83 = arith.fptosi %82 : vector<1x256xf32> to vector<1x256xi32>
    %cst_25 = arith.constant 1.000000e+00 : f32
    %84 = vector.broadcast %cst_25 : f32 to vector<1x256xf32>
    %85 = arith.addf %54, %84 : vector<1x256xf32>
    %cst_26 = arith.constant 3.125000e-02 : f32
    %86 = vector.broadcast %cst_26 : f32 to vector<1x256xf32>
    %87 = arith.mulf %85, %86 : vector<1x256xf32>
    %88 = math.floor %87 : vector<1x256xf32>
    %cst_27 = arith.constant 3.200000e+01 : f32
    %89 = vector.broadcast %cst_27 : f32 to vector<1x256xf32>
    %90 = arith.mulf %88, %89 : vector<1x256xf32>
    %91 = arith.subf %85, %90 : vector<1x256xf32>
    %cst_28 = arith.constant 0.000000e+00 : f32
    %cst_29 = arith.constant 3.100000e+01 : f32
    %92 = vector.broadcast %cst_28 : f32 to vector<1x256xf32>
    %93 = arith.maximumf %92, %91 : vector<1x256xf32>
    %94 = vector.broadcast %cst_29 : f32 to vector<1x256xf32>
    %95 = arith.minimumf %94, %93 : vector<1x256xf32>
    %cst_30 = arith.constant 1.600000e+01 : f32
    %96 = vector.broadcast %cst_30 : f32 to vector<1x256xf32>
    %97 = arith.cmpf oge, %95, %96 : vector<1x256xf32>
    %cst_31 = arith.constant 3.100000e+01 : f32
    %98 = vector.broadcast %cst_31 : f32 to vector<1x256xf32>
    %99 = arith.subf %98, %95 : vector<1x256xf32>
    %100 = arith.select %97, %99, %95 : vector<1x256xi1>, vector<1x256xf32>
    %cst_32 = arith.constant 0.000000e+00 : f32
    %cst_33 = arith.constant 1.500000e+01 : f32
    %101 = vector.broadcast %cst_32 : f32 to vector<1x256xf32>
    %102 = arith.maximumf %101, %100 : vector<1x256xf32>
    %103 = vector.broadcast %cst_33 : f32 to vector<1x256xf32>
    %104 = arith.minimumf %103, %102 : vector<1x256xf32>
    %cst_34 = arith.constant 5.000000e-01 : f32
    %105 = vector.broadcast %cst_34 : f32 to vector<1x256xf32>
    %106 = arith.addf %104, %105 : vector<1x256xf32>
    %107 = arith.fptosi %106 : vector<1x256xf32> to vector<1x256xi32>
    %cst_35 = arith.constant 3.125000e-02 : f32
    %108 = vector.broadcast %cst_35 : f32 to vector<1x256xf32>
    %109 = arith.mulf %55, %108 : vector<1x256xf32>
    %110 = math.floor %109 : vector<1x256xf32>
    %cst_36 = arith.constant 3.200000e+01 : f32
    %111 = vector.broadcast %cst_36 : f32 to vector<1x256xf32>
    %112 = arith.mulf %110, %111 : vector<1x256xf32>
    %113 = arith.subf %55, %112 : vector<1x256xf32>
    %cst_37 = arith.constant 0.000000e+00 : f32
    %cst_38 = arith.constant 3.100000e+01 : f32
    %114 = vector.broadcast %cst_37 : f32 to vector<1x256xf32>
    %115 = arith.maximumf %114, %113 : vector<1x256xf32>
    %116 = vector.broadcast %cst_38 : f32 to vector<1x256xf32>
    %117 = arith.minimumf %116, %115 : vector<1x256xf32>
    %cst_39 = arith.constant 1.600000e+01 : f32
    %118 = vector.broadcast %cst_39 : f32 to vector<1x256xf32>
    %119 = arith.cmpf oge, %117, %118 : vector<1x256xf32>
    %cst_40 = arith.constant 3.100000e+01 : f32
    %120 = vector.broadcast %cst_40 : f32 to vector<1x256xf32>
    %121 = arith.subf %120, %117 : vector<1x256xf32>
    %122 = arith.select %119, %121, %117 : vector<1x256xi1>, vector<1x256xf32>
    %cst_41 = arith.constant 0.000000e+00 : f32
    %cst_42 = arith.constant 1.500000e+01 : f32
    %123 = vector.broadcast %cst_41 : f32 to vector<1x256xf32>
    %124 = arith.maximumf %123, %122 : vector<1x256xf32>
    %125 = vector.broadcast %cst_42 : f32 to vector<1x256xf32>
    %126 = arith.minimumf %125, %124 : vector<1x256xf32>
    %cst_43 = arith.constant 5.000000e-01 : f32
    %127 = vector.broadcast %cst_43 : f32 to vector<1x256xf32>
    %128 = arith.addf %126, %127 : vector<1x256xf32>
    %129 = arith.fptosi %128 : vector<1x256xf32> to vector<1x256xi32>
    %cst_44 = arith.constant 1.000000e+00 : f32
    %130 = vector.broadcast %cst_44 : f32 to vector<1x256xf32>
    %131 = arith.addf %55, %130 : vector<1x256xf32>
    %cst_45 = arith.constant 3.125000e-02 : f32
    %132 = vector.broadcast %cst_45 : f32 to vector<1x256xf32>
    %133 = arith.mulf %131, %132 : vector<1x256xf32>
    %134 = math.floor %133 : vector<1x256xf32>
    %cst_46 = arith.constant 3.200000e+01 : f32
    %135 = vector.broadcast %cst_46 : f32 to vector<1x256xf32>
    %136 = arith.mulf %134, %135 : vector<1x256xf32>
    %137 = arith.subf %131, %136 : vector<1x256xf32>
    %cst_47 = arith.constant 0.000000e+00 : f32
    %cst_48 = arith.constant 3.100000e+01 : f32
    %138 = vector.broadcast %cst_47 : f32 to vector<1x256xf32>
    %139 = arith.maximumf %138, %137 : vector<1x256xf32>
    %140 = vector.broadcast %cst_48 : f32 to vector<1x256xf32>
    %141 = arith.minimumf %140, %139 : vector<1x256xf32>
    %cst_49 = arith.constant 1.600000e+01 : f32
    %142 = vector.broadcast %cst_49 : f32 to vector<1x256xf32>
    %143 = arith.cmpf oge, %141, %142 : vector<1x256xf32>
    %cst_50 = arith.constant 3.100000e+01 : f32
    %144 = vector.broadcast %cst_50 : f32 to vector<1x256xf32>
    %145 = arith.subf %144, %141 : vector<1x256xf32>
    %146 = arith.select %143, %145, %141 : vector<1x256xi1>, vector<1x256xf32>
    %cst_51 = arith.constant 0.000000e+00 : f32
    %cst_52 = arith.constant 1.500000e+01 : f32
    %147 = vector.broadcast %cst_51 : f32 to vector<1x256xf32>
    %148 = arith.maximumf %147, %146 : vector<1x256xf32>
    %149 = vector.broadcast %cst_52 : f32 to vector<1x256xf32>
    %150 = arith.minimumf %149, %148 : vector<1x256xf32>
    %cst_53 = arith.constant 5.000000e-01 : f32
    %151 = vector.broadcast %cst_53 : f32 to vector<1x256xf32>
    %152 = arith.addf %150, %151 : vector<1x256xf32>
    %153 = arith.fptosi %152 : vector<1x256xf32> to vector<1x256xi32>
    %154 = vector.broadcast %83 : vector<1x256xi32> to vector<16x256xi32>
    %155 = arith.cmpi eq, %52, %154 : vector<16x256xi32>
    %cst_54 = arith.constant 0.000000e+00 : f32
    %156 = vector.shape_cast %58 : vector<1x256xf32> to vector<1x256xf32>
    %157 = vector.broadcast %156 : vector<1x256xf32> to vector<16x256xf32>
    %158 = vector.broadcast %cst_54 : f32 to vector<16x256xf32>
    %159 = arith.select %155, %157, %158 : vector<16x256xi1>, vector<16x256xf32>
    %160 = vector.broadcast %107 : vector<1x256xi32> to vector<16x256xi32>
    %161 = arith.cmpi eq, %52, %160 : vector<16x256xi32>
    %cst_55 = arith.constant 0.000000e+00 : f32
    %162 = vector.shape_cast %56 : vector<1x256xf32> to vector<1x256xf32>
    %163 = vector.broadcast %162 : vector<1x256xf32> to vector<16x256xf32>
    %164 = vector.broadcast %cst_55 : f32 to vector<16x256xf32>
    %165 = arith.select %161, %163, %164 : vector<16x256xi1>, vector<16x256xf32>
    %166 = arith.addf %159, %165 : vector<16x256xf32>
    %167 = vector.broadcast %129 : vector<1x256xi32> to vector<16x256xi32>
    %168 = arith.cmpi eq, %53, %167 : vector<16x256xi32>
    %cst_56 = arith.constant 0.000000e+00 : f32
    %169 = vector.shape_cast %61 : vector<1x256xf32> to vector<1x256xf32>
    %170 = vector.broadcast %169 : vector<1x256xf32> to vector<16x256xf32>
    %171 = vector.broadcast %cst_56 : f32 to vector<16x256xf32>
    %172 = arith.select %168, %170, %171 : vector<16x256xi1>, vector<16x256xf32>
    %173 = vector.broadcast %153 : vector<1x256xi32> to vector<16x256xi32>
    %174 = arith.cmpi eq, %53, %173 : vector<16x256xi32>
    %cst_57 = arith.constant 0.000000e+00 : f32
    %175 = vector.shape_cast %59 : vector<1x256xf32> to vector<1x256xf32>
    %176 = vector.broadcast %175 : vector<1x256xf32> to vector<16x256xf32>
    %177 = vector.broadcast %cst_57 : f32 to vector<16x256xf32>
    %178 = arith.select %174, %176, %177 : vector<16x256xi1>, vector<16x256xf32>
    %179 = arith.addf %172, %178 : vector<16x256xf32>
    %c0_58 = arith.constant 0 : index
    %c0_59 = arith.constant 0 : index
    %c0_60 = arith.constant 0 : index
    %180 = vector.load %arg3[%c0_58, %c0_59, %c0_60] : memref<1x64x16xbf16, #tpu.memory_space<vmem>>, vector<1x64x16xbf16>
    %181 = vector.shape_cast %180 : vector<1x64x16xbf16> to vector<64x16xbf16>
    %182 = arith.truncf %179 : vector<16x256xf32> to vector<16x256xbf16>
    %cst_61 = arith.constant dense<0.000000e+00> : vector<64x256xf32>
    %183 = tpu.matmul %181, %182, %cst_61 {dimension_numbers = #tpu.dot_dimension_numbers<[1], [0], [0], [1], [0, 0, 1, 1], [], []>} : vector<64x16xbf16>, vector<16x256xbf16>, vector<64x256xf32> -> vector<64x256xf32>
    %184 = vector.extract_strided_slice %183 {offsets = [0, 0], sizes = [16, 256], strides = [1, 1]} : vector<64x256xf32> to vector<16x256xf32>
    %185 = arith.mulf %166, %184 : vector<16x256xf32>
    %cst_62 = arith.constant dense<0.000000e+00> : vector<256xf32>
    %186 = vector.multi_reduction <add>, %185, %cst_62 [0] : vector<16x256xf32> to vector<256xf32>
    %187 = vector.shape_cast %186 : vector<256xf32> to vector<1x256xf32>
    %c0_63 = arith.constant 0 : index
    %c0_64 = arith.constant 0 : index
    %c0_65 = arith.constant 0 : index
    %188 = vector.load %arg5[%c0_63, %c0_64, %c0_65] : memref<1x4x256xf32, #tpu.memory_space<vmem>>, vector<1x1x256xf32>
    %189 = vector.shape_cast %188 : vector<1x1x256xf32> to vector<1x256xf32>
    %190 = vector.shape_cast %187 : vector<1x256xf32> to vector<1x1x256xf32>
    tpu.vector_store %arg5[%c0_63, %c0_64, %c0_65], %190 {strides = array<i32>} : memref<1x4x256xf32, #tpu.memory_space<vmem>>, vector<1x1x256xf32>,
    %191 = vector.extract_strided_slice %183 {offsets = [16, 0], sizes = [16, 256], strides = [1, 1]} : vector<64x256xf32> to vector<16x256xf32>
    %192 = arith.mulf %166, %191 : vector<16x256xf32>
    %cst_66 = arith.constant dense<0.000000e+00> : vector<256xf32>
    %193 = vector.multi_reduction <add>, %192, %cst_66 [0] : vector<16x256xf32> to vector<256xf32>
    %194 = vector.shape_cast %193 : vector<256xf32> to vector<1x256xf32>
    %c0_67 = arith.constant 0 : index
    %c1_68 = arith.constant 1 : index
    %c0_69 = arith.constant 0 : index
    %195 = vector.load %arg5[%c0_67, %c1_68, %c0_69] : memref<1x4x256xf32, #tpu.memory_space<vmem>>, vector<1x1x256xf32>
    %196 = vector.shape_cast %195 : vector<1x1x256xf32> to vector<1x256xf32>
    %197 = vector.shape_cast %194 : vector<1x256xf32> to vector<1x1x256xf32>
    tpu.vector_store %arg5[%c0_67, %c1_68, %c0_69], %197 {strides = array<i32>} : memref<1x4x256xf32, #tpu.memory_space<vmem>>, vector<1x1x256xf32>,
    %198 = vector.extract_strided_slice %183 {offsets = [32, 0], sizes = [16, 256], strides = [1, 1]} : vector<64x256xf32> to vector<16x256xf32>
    %199 = arith.mulf %166, %198 : vector<16x256xf32>
    %cst_70 = arith.constant dense<0.000000e+00> : vector<256xf32>
    %200 = vector.multi_reduction <add>, %199, %cst_70 [0] : vector<16x256xf32> to vector<256xf32>
    %201 = vector.shape_cast %200 : vector<256xf32> to vector<1x256xf32>
    %c0_71 = arith.constant 0 : index
    %c2_72 = arith.constant 2 : index
    %c0_73 = arith.constant 0 : index
    %202 = vector.load %arg5[%c0_71, %c2_72, %c0_73] : memref<1x4x256xf32, #tpu.memory_space<vmem>>, vector<1x1x256xf32>
    %203 = vector.shape_cast %202 : vector<1x1x256xf32> to vector<1x256xf32>
    %204 = vector.shape_cast %201 : vector<1x256xf32> to vector<1x1x256xf32>
    tpu.vector_store %arg5[%c0_71, %c2_72, %c0_73], %204 {strides = array<i32>} : memref<1x4x256xf32, #tpu.memory_space<vmem>>, vector<1x1x256xf32>,
    %205 = vector.extract_strided_slice %183 {offsets = [48, 0], sizes = [16, 256], strides = [1, 1]} : vector<64x256xf32> to vector<16x256xf32>
    %206 = arith.mulf %166, %205 : vector<16x256xf32>
    %cst_74 = arith.constant dense<0.000000e+00> : vector<256xf32>
    %207 = vector.multi_reduction <add>, %206, %cst_74 [0] : vector<16x256xf32> to vector<256xf32>
    %208 = vector.shape_cast %207 : vector<256xf32> to vector<1x256xf32>
    %c0_75 = arith.constant 0 : index
    %c3_76 = arith.constant 3 : index
    %c0_77 = arith.constant 0 : index
    %209 = vector.load %arg5[%c0_75, %c3_76, %c0_77] : memref<1x4x256xf32, #tpu.memory_space<vmem>>, vector<1x1x256xf32>
    %210 = vector.shape_cast %209 : vector<1x1x256xf32> to vector<1x256xf32>
    %211 = vector.shape_cast %208 : vector<1x256xf32> to vector<1x1x256xf32>
    tpu.vector_store %arg5[%c0_75, %c3_76, %c0_77], %211 {strides = array<i32>} : memref<1x4x256xf32, #tpu.memory_space<vmem>>, vector<1x1x256xf32>,
    return
  }
  func.func @transform_0(%arg0: i32, %arg1: i32) -> (i32, i32) {
    %c0_i32 = arith.constant 0 : i32
    %c0_i32_0 = arith.constant 0 : i32
    %c0_i32_1 = arith.constant 0 : i32
    return %c0_i32, %c0_i32_0 : i32, i32
  }
  func.func @transform_1(%arg0: i32, %arg1: i32) -> (i32, i32, i32) {
    %c0_i32 = arith.constant 0 : i32
    %c0_i32_0 = arith.constant 0 : i32
    %c0_i32_1 = arith.constant 0 : i32
    return %arg0, %c0_i32, %c0_i32_0 : i32, i32, i32
  }
  func.func @transform_2(%arg0: i32, %arg1: i32) -> (i32, i32, i32) {
    %c0_i32 = arith.constant 0 : i32
    %c0_i32_0 = arith.constant 0 : i32
    return %arg0, %c0_i32, %arg1 : i32, i32, i32
  }
  func.func @transform_3(%arg0: i32, %arg1: i32) -> (i32, i32, i32) {
    %c0_i32 = arith.constant 0 : i32
    %c0_i32_0 = arith.constant 0 : i32
    return %arg0, %c0_i32, %arg1 : i32, i32, i32
  }
  func.func @transform_4(%arg0: i32, %arg1: i32) -> (i32, i32, i32) {
    %c0_i32 = arith.constant 0 : i32
    %c0_i32_0 = arith.constant 0 : i32
    return %arg0, %c0_i32, %arg1 : i32, i32, i32
  }
}

</mosaic_0001>

<bundles_post_ra>
// kernel: _lambda_.3
= control target key start
LH: loop header
LB: loop body
LE: loop exit
PB: predicated region body
PF: predicated region fallthrough
CT: control target
= control target key end

     0   :  { %s472_s12 = smov 0   ;;  %s507_s0 = inlined_call_operand.vmem [shape: f32[16,16], index: 0, kind: input, shape index: {}]   ;;  %s508_s1 = inlined_call_operand.vmem [shape: f32[16,16], index: 1, kind: input, shape index: {}]   ;;  %s509_s2 = inlined_call_operand.vmem [shape: f32[4,16,16], index: 2, kind: input, shape index: {}]   ;;  %s510_s3 = inlined_call_operand.vmem [shape: f32[4,16,16], index: 3, kind: output, shape index: {}]  }
   0x1 LB: > { %s397_s13 = sadd.s32 4294967295, %s450_s12   ;;  %p401_p0 = scmp.ge.s32.totalorder %s450_s12, 1  ;;  %s450_s12 = sphi %s472_s12, %s13_s12  }
   0x2   : > { %p137_p1 = scmp.lt.s32.totalorder %s450_s12, 5 }
   0x4   : > { %p138_p2 = pnand %p401_p0, %p137_p1 }
   0x5   : > { %p161_p3 = scmp.lt.s32.totalorder (!%p138_p2), %s397_s13, 3 }
   0x6   : > { %141 = sbr.rel (%p138_p2) target bundleno = 409 (0x199), region = 32 }
   0xb   : > { %v174_v0 = vld [vmem:[%s508_s1 + $0x8] sm:$0xff]  ;;  %v173_v1 = vld [vmem:[%s508_s1] sm:$0xff]  ;;  %s512_s13 = smov (!%p161_p3, %s397_s13), 3  ;;  %vm175_vm0 = vcmask 130048  }
   0xc   : > { %422 = vmatprep.subr.mxu0 %v174_v0  ;;  %s412_s18 = sshll.u32 %s512_s13, 4  ;;  %v257_v4 = vld [vmem:[%s507_s0] sm:$0xff]  ;;  %v258_v7 = vld [vmem:[%s507_s0 + $0x8] sm:$0xff] }
   0xd   : > { %423 = vmatpush3.msra.mxu0 %v174_v0  ;;  %s165_s21 = scalar_lea.vmem %s509_s2, %s412_s18  ;;  %433 = vmatprep.mubr.msk.f32.mxu1 %vm175_vm0, %v257_v4  ;;  %s170_s28 = scalar_lea.vmem %s510_s3, %s412_s18 }
   0xe   : > { %424 = vmatprep.subr.mxu0 %v173_v1  ;;  %v171_v2 = vld [vmem:[%s165_s21] sm:$0xff]  ;;  %v172_v3 = vld [vmem:[%s165_s21 + $0x8] sm:$0xff] }
   0xf   : > { %425 = vmatpush3.msra.mxu0 %v173_v1  ;;  %426 = vmatprep.mubr.msk.f32.mxu0 %vm175_vm0, %v171_v2 }
  0x10   : > { %427 = vmatmul.mubr.msk.f32.vlgmr.msra.gmra.mxu0 %vm175_vm0, %v172_v3 }
  0xd0   : > { %v428_v5 = vpop.f32.mrf.mxu0 }
  0xd1   : > { %429 = vmatprep.subr.mxu1 %v428_v5 }
  0xd2   : > { %v248_v6 = vpop.f32.mrf.mxu0  ;;  %430 = vmatpush3.msra.mxu1 %v428_v5 }
  0xd3   : > { %431 = vmatprep.subr.mxu1 %v248_v6 }
  0xd4   : > { %432 = vmatpush3.msra.mxu1 %v248_v6 }
  0xd5   : > { %434 = vmatmul.mubr.msk.f32.vlgmr.msra.gmra.mxu1 %vm175_vm0, %v258_v7 }
 0x195   : > { %v435_v8 = vpop.f32.mrf.mxu1 }
 0x196   : > { %341 = vst.msk [vmem:[%s170_s28 + $0x8] sm:$0xff] %vm175_vm0, %v435_v8 }
 0x197   : > { %v331_v9 = vpop.f32.mrf.mxu1 }
 0x198   : > { %340 = vst.msk [vmem:[%s170_s28] sm:$0xff] %vm175_vm0, %v331_v9 }
 0x199 PF: > { %s13_s12 = sadd.s32 1, %s450_s12  }
 0x19a   : > { %p10_p4 = scmp.ge.s32.totalorder %s13_s12, 6  }
 0x19c   :  { %12 = sbr.rel (!%p10_p4) target bundleno = 1 (0x1), region = 62 }

// kernel: _lambda_.5
= control target key start
LH: loop header
LB: loop body
LE: loop exit
PB: predicated region body
PF: predicated region fallthrough
CT: control target
= control target key end

     0   :  { %10 = vsyncpa [#allocation3], 0  ;;  %s1241_s15 = smov 0   ;;  %s1243_s16 = smov 0   ;;  %s1453_s0 = inlined_call_operand.vmem [shape: f32[2,8], index: 0, kind: input, shape index: {}]   ;;  %s1454_s1 = inlined_call_operand.vmem [shape: bf16[2,64,16], index: 1, kind: input, shape index: {}]   ;;  %s1455_s2 = inlined_call_operand.vmem [shape: f32[2,2,256], index: 2, kind: input, shape index: {}]   ;;  %s1456_s3 = inlined_call_operand.vmem [shape: f32[2,4,256], index: 3, kind: output, shape index: {0}]   ;;  %s1457_s4 = inlined_call_operand.vmem [shape: f32[2,2,256], index: 4, kind: output, shape index: {1}]  }
   0x1   :  { %s1245_s17 = smov 0  }
   0x2 LB: > { %s1076_s18 = sadd.s32 4294967295, %s1211_s17   ;;  %s28_s19 = sadd.s32 1, %s1207_s16  ;;  %s1211_s17 = sphi %s1245_s17, %s16_s17   ;;  %s1207_s16 = sphi %s1243_s16, %s1463_s16   ;;  %s1203_s15 = sphi %s1241_s15, %s1462_s15  }
   0x3   : > { %p30_p0 = scmp.ge.s32.totalorder %s28_s19, 2  ;;  %p1078_p1 = scmp.ge.s32.totalorder %s1211_s17, 1 }
   0x4   : > { %p164_p2 = scmp.lt.s32.totalorder %s1211_s17, 3  ;;  %p1266_p4 = scmp.eq.s32.totalorder %s1076_s18, 0 }
   0x5   : > { %s1465_s19 = smov (%p30_p0, %s28_s19), 0  ;;  %s177_s24 = sshll.u32 %s1453_s0, 4  ;;  %s178_s24 = int_to_ptr.vmem [resolvable:$true] %s177_s24 }
   0x6   : > { %p1262_p3 = pnand %p1078_p1, %p164_p2  ;;  %s1170_s25 = scalar_lea.vmem %s178_s24, 32 }
   0x7   : > { %p1171_p7 = scmp.ne.s32.totalorder %s178_s24, %s1170_s25  ;;  %p1178_p11 = scmp.lt.s32.totalorder %s178_s24, %s178_s24 }
   0x8   : > { %p1133_p5 = pneg %p1262_p3  ;;  %p1179_p12 = scmp.lt.s32.totalorder %s1170_s25, %s1170_s25 }
   0xa   : > { %p1134_p6 = pnand %p1266_p4, %p1133_p5  ;;  %p1180_p13 = por %p1179_p12, %p1178_p11 }
   0xc   : > { %p1172_p8 = pneg %p1134_p6 }
   0xe   : > { %p1173_p9 = pnand %p1172_p8, %p1171_p7 }
  0x10   : > { %p1174_p10 = pneg %p1173_p9 }
  0x12   : > { %p1181_p0 = pnand %p1180_p13, %p1174_p10 }
  0x14   : > { %1184 = shalt.err (!%p1181_p0)
}
  0x15   : > { %s1213_s26 = smov [#allocation2]   ;;  %211 = sbr.rel (%p1262_p3) target bundleno = 327 (0x147), region = 32 }
  0x16   : > { %1136 = dma.vmem_to_smem (!%p1134_p6), %s178_s24, 32, %s1213_s26, [#allocation3]  }
  0x1a   : > { %1198 = dma.done.wait (%p1266_p4), [#allocation3], 32  }
  0x1b   : > { %1200 = vsyncadd (%p1266_p4), [#allocation3], 4294967264 }
  0x1c   : > { %217 = sfence }
  0x1d   : > { %p260_p1 = scmp.lt.s32.totalorder %s1203_s15, 1  ;;  %v297_v0 = vlaneseq  ;;  %s1285_s27 = sshll.u32 %s1203_s15, 7  ;;  %v1214_v1 = vmov 0   ;;  %v1215_v37 = vmov 1966171168   ;;  %vm678_vm13 = vcmask 130048  }
  0x1e   : > { %s346_s28 = sadd.s32 1, %s1285_s27  ;;  %723 = vmatprep.mubr.bf16.mxu0 %v1214_v1  ;;  %743 = vmatprep.mubr.bf16.mxu1 %v1214_v1  ;;  %s348_s29 = sadd.s32 2, %s1285_s27  ;;  %v382_v38 = vunpack.c.l.s4 %v1215_v37 }
  0x1f   : > { %s1467_s15 = smov (!%p260_p1, %s1203_s15), 1  ;;  %v298_v2 = vand.u32 127, %v297_v0  ;;  %v1295_v3 = vshrl.u32 %v297_v0, 7  ;;  %s1300_s5 = sld [smem:[#allocation2 + %s1285_s27]]  ;;  %vm1359_vm0 = vcmp.lt.s32.totalorder %v297_v0, 256 }
  0x20   : > { %s1108_s30 = sshll.u32 %s1467_s15, 2  ;;  %s1310_s9 = sld [smem:[#allocation2 + %s346_s28]]  ;;  %v383_v48 = vunpack.c.0.s8 %v382_v38 }
  0x21   : > { %v299_v4 = vadd.s32 128, %v298_v2  ;;  %s273_s8 = scalar_lea.vmem %s1455_s2, %s1108_s30  ;;  %v1308_v5 = vsub.s32 0, %v1295_v3  ;;  %v303_v6 = vcvt.s32.f32 %v298_v2  ;;  %v323_v9 = vsub.s32 1, %v1295_v3  ;;  %s1313_s10 = sld [smem:[#allocation2 + %s348_s29]] }
  0x22   : > { %v315_v8 = vld [vmem:[%s273_s8] ss:$2 sm:$0x3]  ;;  %s350_s11 = sadd.s32 3, %s1285_s27  ;;  %s354_s12 = sadd.s32 5, %s1285_s27  ;;  %v1347_v54 = vsub.s32 %v383_v48, %v1295_v3 }
  0x23   : > { %v304_v7 = vcvt.s32.f32 %v299_v4  ;;  %v305_v10 = vadd.f32 0.5, %v303_v6  ;;  %s1317_s13 = sld [smem:[#allocation2 + %s350_s11]]  ;;  %s1107_s14 = sshll.u32 %s1467_s15, 5  ;;  %v1091_v12 = vld [vmem:[%s273_s8 + $0x1] ss:$2 sm:$0x3]  ;;  %v320_v14 = vrot.slane %v315_v8, %v1308_v5  ;;  %v324_v16 = vrot.slane %v315_v8, %v323_v9 }
  0x24   : > { %s1324_s21 = scalar_lea.vmem %s1454_s1, %s1107_s14  ;;  %s1326_s22 = sld [smem:[#allocation2 + %s354_s12]]  ;;  %v335_v22 = vrot.slane %v1091_v12, %v1308_v5  ;;  %v339_v25 = vrot.slane %v1091_v12, %v323_v9 }
  0x25   : > { %v306_v11 = vadd.f32 0.5, %v304_v7  ;;  %v307_v13 = vmul.f32 0.0625, %v305_v10  ;;  %s352_s23 = sadd.s32 4, %s1285_s27  ;;  %v356_v19 = vstv %s1300_s5  ;;  %s1355_s27 = scalar_lea.vmem %s1457_s4, %s1108_s30 }
  0x26   : > { %s1330_s24 = sld [smem:[#allocation2 + %s352_s23]]  ;;  %v359_v31 = vstv %s1310_s9  ;;  %s1109_s28 = sshll.u32 %s1467_s15, 3 }
  0x27   : > { %v308_v15 = vmul.f32 0.0625, %v306_v11  ;;  %v309_v17 = vfloor.f32 %v307_v13  ;;  %v367_v26 = vstv %s1313_s10  ;;  %s283_s5 = scalar_lea.vmem %s1456_s3, %s1109_s28 }
  0x29   : > { %v310_v18 = vfloor.f32 %v308_v15  ;;  %v311_v20 = vmul.f32 16.0, %v309_v17  ;;  %v327_v21 = vadd.f32 %v320_v14, %v309_v17  ;;  %v370_v32 = vstv %s1317_s13 }
  0x2a   : > { %v375_v43 = vstv %s1326_s22 }
  0x2b   : > { %v312_v23 = vmul.f32 16.0, %v310_v18  ;;  %v328_v24 = vadd.f32 %v324_v16, %v310_v18  ;;  %v313_v27 = vsub.f32 %v303_v6, %v311_v20  ;;  %v357_v28 = vmul.f32 %v356_v19, %v327_v21 }
  0x2c   : > { %v368_v34 = vmul.f32 %v367_v26, %v327_v21  ;;  %v364_v44 = vstv %s1330_s24 }
  0x2d   : > { %v314_v29 = vsub.f32 %v304_v7, %v312_v23  ;;  %v1334_v30 = vmul.f32 %v356_v19, %v328_v24  ;;  %v342_v33 = vadd.f32 %v335_v22, %v313_v27  ;;  %v369_v36 = vmul.f32 %v367_v26, %v328_v24 }
  0x2f   : > { %v343_v35 = vadd.f32 %v339_v25, %v314_v29  ;;  %v360_v39 = vmul.f32 %v359_v31, %v342_v33  ;;  %v371_v40 = vmul.f32 %v370_v32, %v342_v33 }
  0x31   : > { %v1338_v41 = vmul.f32 %v359_v31, %v343_v35  ;;  %v372_v42 = vmul.f32 %v370_v32, %v343_v35  ;;  %v373_v45 = vadd.f32 %v371_v40, %v368_v34  ;;  %v362_v46 = vadd.f32 %v360_v39, %v357_v28 }
  0x33   : > { %v374_v47 = vadd.f32 %v372_v42, %v369_v36  ;;  %v376_v49 = vadd.f32 %v375_v43, %v373_v45  ;;  %v1344_v50 = vadd.f32 %v364_v44, %v362_v46 }
  0x35   : > { %v377_v51 = vadd.f32 %v375_v43, %v374_v47  ;;  %v426_v52 = vfloor.f32 %v376_v49 }
  0x37   : > { %v427_v53 = vfloor.f32 %v377_v51  ;;  %v403_v55 = vcombine.low %v376_v49, %v377_v51  ;;  %v490_v56 = vmul.f32 0.03125, %v426_v52  ;;  %v516_v57 = vadd.f32 1.0, %v426_v52 }
  0x38   : > { %v432_v33 = vsub.f32 %v376_v49, %v426_v52 }
  0x39   : > { %v491_v58 = vmul.f32 0.03125, %v427_v53  ;;  %v517_v59 = vadd.f32 1.0, %v427_v53  ;;  %v410_v60 = vrot.slane %v403_v55, %v1347_v54  ;;  %v492_v61 = vfloor.f32 %v490_v56 }
  0x3a   : > { %v518_v62 = vmul.f32 0.03125, %v516_v57  ;;  %v433_v35 = vsub.f32 %v377_v51, %v427_v53  ;;  %v434_v47 = vsub.f32 1.0, %v432_v33 }
  0x3b   : > { %v493_v63 = vfloor.f32 %v491_v58  ;;  %v519_v2 = vmul.f32 0.03125, %v517_v59  ;;  %v417_v4 = vrot.slane %v410_v60, %v1347_v54  ;;  %v494_v6 = vmul.f32 32.0, %v492_v61 }
  0x3c   : > { %v520_v7 = vfloor.f32 %v518_v62  ;;  %v435_v48 = vsub.f32 1.0, %v433_v35  ;;  %v611_v60 = vrot.slane %v434_v47, %v1308_v5 }
  0x3d   : > { %v495_v8 = vmul.f32 32.0, %v493_v63  ;;  %v521_v9 = vfloor.f32 %v519_v2  ;;  %1093 = vst.msk [vmem:[%s1355_s27 + $0x1] ss:$2 sm:$0x3] %vm1359_vm0, %v417_v4  ;;  %v496_v11 = vsub.f32 %v426_v52, %v494_v6  ;;  %v635_v6 = vrot.slane %v432_v33, %v1308_v5 }
  0x3e   : > { %v522_v12 = vmul.f32 32.0, %v520_v7  ;;  %v615_v61 = vrot.slane %v435_v48, %v1308_v5  ;;  %v639_v7 = vrot.slane %v433_v35, %v1308_v5 }
  0x3f   : > { %v497_v13 = vsub.f32 %v427_v53, %v495_v8  ;;  %v523_v14 = vmul.f32 32.0, %v521_v9  ;;  %v498_v15 = vmax.f32 %v496_v11, 0.0 }
  0x40   : > { %v524_v16 = vsub.f32 %v516_v57, %v522_v12 }
  0x41   : > { %v499_v17 = vmax.f32 %v497_v13, 0.0  ;;  %v525_v18 = vsub.f32 %v517_v59, %v523_v14  ;;  %v500_v19 = vmin.f32 %v498_v15, 31.0  ;;  %v1367_v59 = vadd.s32 8, %v1295_v3 }
  0x42   : > { %v526_v20 = vmax.f32 %v524_v16, 0.0 }
  0x43   : > { %v501_v21 = vmin.f32 %v499_v17, 31.0  ;;  %v527_v22 = vmax.f32 %v525_v18, 0.0  ;;  %vm502_vm1 = vcmp.ge.f32.partialorder %v500_v19, 16.0  ;;  %v504_v0 = vsub.f32 31.0, %v500_v19 }
  0x44   : > { %v528_v23 = vmin.f32 %v526_v20, 31.0 }
  0x45   : > { %vm503_vm2 = vcmp.ge.f32.partialorder %v501_v21, 16.0  ;;  %v505_v24 = vsub.f32 31.0, %v501_v21  ;;  %v529_v25 = vmin.f32 %v527_v22, 31.0  ;;  %v506_v26 = vsel %vm502_vm1, %v504_v0, %v500_v19 }
  0x46   : > { %vm530_vm3 = vcmp.ge.f32.partialorder %v528_v23, 16.0  ;;  %v532_v27 = vsub.f32 31.0, %v528_v23  ;;  %v508_v31 = vmax.f32 %v506_v26, 0.0  ;;  %v1168_v26 = vld [vmem:[%s1324_s21 + $0x8] sm:$0xff]  }
  0x47   : > { %v507_v28 = vsel %vm503_vm2, %v505_v24, %v501_v21  ;;  %vm531_vm4 = vcmp.ge.f32.partialorder %v529_v25, 16.0  ;;  %v533_v29 = vsub.f32 31.0, %v529_v25  ;;  %v1166_v24 = vld [vmem:[%s1324_s21] sm:$0xff]  }
  0x48   : > { %v509_v32 = vmax.f32 %v507_v28, 0.0  ;;  %v534_v34 = vsel %vm530_vm3, %v532_v27, %v528_v23  ;;  %v510_v37 = vmin.f32 %v508_v31, 15.0  ;;  %v1169_v27 = vld [vmem:[%s1324_s21 + $0x18] sm:$0xff]   ;;  %v363_v28 = vadd.f32 %v1338_v41, %v1334_v30 }
  0x49   : > { %v535_v36 = vsel %vm531_vm4, %v533_v29, %v529_v25  ;;  %v536_v38 = vmax.f32 %v534_v34, 0.0  ;;  %v1167_v25 = vld [vmem:[%s1324_s21 + $0x10] sm:$0xff]  }
  0x4a   : > { %v511_v39 = vmin.f32 %v509_v32, 15.0  ;;  %v537_v40 = vmax.f32 %v535_v36, 0.0  ;;  %v512_v42 = vadd.f32 0.5, %v510_v37  ;;  %v1395_v29 = vadd.f32 %v364_v44, %v363_v28 }
  0x4b   : > { %v538_v43 = vmin.f32 %v536_v38, 15.0 }
  0x4c   : > { %v513_v45 = vadd.f32 0.5, %v511_v39  ;;  %v539_v46 = vmin.f32 %v537_v40, 15.0  ;;  %v1121_v55 = vtrunc.f32 %v512_v42  ;;  %v380_v31 = vcombine.low %v1344_v50, %v1395_v29 }
  0x4d   : > { %v540_v56 = vadd.f32 0.5, %v538_v43  ;;  %v425_v34 = vfloor.f32 %v1395_v29 }
  0x4e   : > { %v1123_v57 = vtrunc.f32 %v513_v45  ;;  %v541_v58 = vadd.f32 0.5, %v539_v46  ;;  %v1122_v49 = vcvt.f32.s32 %v1121_v55  ;;  %v387_v32 = vrot.slane %v380_v31, %v1347_v54 }
  0x4f   : > { %v1125_v51 = vtrunc.f32 %v540_v56  ;;  %v463_v36 = vadd.f32 1.0, %v425_v34  ;;  %v437_v44 = vmul.f32 0.03125, %v425_v34 }
  0x50   : > { %v1124_v52 = vcvt.f32.s32 %v1123_v57  ;;  %v1127_v53 = vtrunc.f32 %v541_v58  ;;  %v599_v63 = vrot.slane %v1122_v49, %v1308_v5  ;;  %v394_v33 = vrot.slane %v387_v32, %v1347_v54 }
  0x51   : > { %v1126_v62 = vcvt.f32.s32 %v1125_v51  ;;  %v465_v37 = vmul.f32 0.03125, %v463_v36  ;;  %v439_v40 = vfloor.f32 %v437_v44  ;;  %v429_v32 = vsub.f32 %v1395_v29, %v425_v34 }
  0x52   : > { %v1128_v2 = vcvt.f32.s32 %v1127_v53  ;;  %v603_v4 = vrot.slane %v1124_v52, %v1308_v5  ;;  %vm604_vm5 = vcmp.eq.s32.totalorder %v1295_v3, %v599_v63  ;;  %vm606_vm6 = vcmp.eq.s32.totalorder %v1367_v59, %v599_v63  ;;  %400 = vst.msk [vmem:[%s1355_s27] ss:$2 sm:$0x3] %vm1359_vm0, %v394_v33 }
  0x53   : > { %v623_v8 = vrot.slane %v1126_v62, %v1308_v5  ;;  %v616_v11 = vsel %vm604_vm5, %v611_v60, 0.0  ;;  %v618_v14 = vsel %vm606_vm6, %v611_v60, 0.0  ;;  %v467_v42 = vfloor.f32 %v465_v37 }
  0x54   : > { %vm605_vm7 = vcmp.eq.s32.totalorder %v1295_v3, %v603_v4  ;;  %vm607_vm8 = vcmp.eq.s32.totalorder %v1367_v59, %v603_v4  ;;  %v627_v9 = vrot.slane %v1128_v2, %v1308_v5  ;;  %v441_v46 = vmul.f32 32.0, %v439_v40 }
  0x55   : > { %v617_v12 = vsel %vm605_vm7, %v615_v61, 0.0  ;;  %v619_v13 = vsel %vm607_vm8, %v615_v61, 0.0  ;;  %vm628_vm9 = vcmp.eq.s32.totalorder %v1295_v3, %v623_v8  ;;  %vm630_vm12 = vcmp.eq.s32.totalorder %v1367_v59, %v623_v8 }
  0x56   : > { %vm629_vm10 = vcmp.eq.s32.totalorder %v1295_v3, %v627_v9  ;;  %vm631_vm11 = vcmp.eq.s32.totalorder %v1367_v59, %v627_v9  ;;  %v640_v15 = vsel %vm628_vm9, %v635_v6, 0.0  ;;  %v642_v18 = vsel %vm630_vm12, %v635_v6, 0.0 }
  0x57   : > { %v641_v16 = vsel %vm629_vm10, %v639_v7, 0.0  ;;  %v643_v17 = vsel %vm631_vm11, %v639_v7, 0.0  ;;  %v644_v19 = vadd.f32 %v640_v15, %v616_v11  ;;  %v646_v22 = vadd.f32 %v642_v18, %v618_v14 }
  0x58   : > { %v645_v20 = vadd.f32 %v641_v16, %v617_v12  ;;  %v647_v21 = vadd.f32 %v643_v17, %v619_v13  ;;  %v469_v47 = vmul.f32 32.0, %v467_v42  ;;  %v443_v56 = vsub.f32 %v425_v34, %v441_v46 }
  0x59   : > { %v656_v23 = vpack.c.bf16 %v646_v22, %v644_v19  ;;  %v431_v44 = vsub.f32 1.0, %v429_v32  ;;  %v587_v34 = vrot.slane %v429_v32, %v1308_v5 }
  0x5a   : > { %v657_v0 = vpack.c.bf16 %v647_v21, %v645_v20  ;;  %v471_v57 = vsub.f32 %v463_v36, %v469_v47  ;;  %v445_v51 = vmax.f32 %v443_v56, 0.0 }
  0x5c   : > { %705 = vmatprep.subr.bf16.mxu0 %v657_v0  ;;  %1111 = vmatprep.subr.bf16.mxu1 %v657_v0  ;;  %v473_v52 = vmax.f32 %v471_v57, 0.0  ;;  %v447_v61 = vmin.f32 %v445_v51, 31.0 }
  0x5d   : > { %706 = vmatpush1.bf16.msra.mxu0 %v656_v23  ;;  %1112 = vmatpush1.bf16.msra.mxu1 %v656_v23 }
  0x5e   : > { %v475_v62 = vmin.f32 %v473_v52, 31.0  ;;  %v451_v4 = vsub.f32 31.0, %v447_v61  ;;  %vm449_vm1 = vcmp.ge.f32.partialorder %v447_v61, 16.0 }
  0x60   : > { %1098 = vmatmul.mubr.msk.bf16.vlgmr.msra.gmra.mxu0 %vm678_vm13, %v1166_v24  ;;  %1100 = vmatmul.mubr.msk.bf16.vlgmr.msra.gmra.mxu1 %vm678_vm13, %v1167_v25  ;;  %v479_v6 = vsub.f32 31.0, %v475_v62  ;;  %vm477_vm2 = vcmp.ge.f32.partialorder %v475_v62, 16.0  ;;  %v453_v9 = vsel %vm449_vm1, %v451_v4, %v447_v61 }
  0x61   : > { %733 = vmatprep.mubr.bf16.mxu0 %v1214_v1  ;;  %753 = vmatprep.mubr.bf16.mxu1 %v1214_v1  ;;  %v424_v1 = vfloor.f32 %v1344_v50  ;;  %v455_v14 = vmax.f32 %v453_v9, 0.0 }
  0x62   : > { %v481_v11 = vsel %vm477_vm2, %v479_v6, %v475_v62 }
  0x63   : > { %v462_v35 = vadd.f32 1.0, %v424_v1  ;;  %v436_v30 = vmul.f32 0.03125, %v424_v1  ;;  %v483_v15 = vmax.f32 %v481_v11, 0.0  ;;  %v457_v18 = vmin.f32 %v455_v14, 15.0 }
  0x65   : > { %v464_v41 = vmul.f32 0.03125, %v462_v35  ;;  %v438_v38 = vfloor.f32 %v436_v30  ;;  %v485_v19 = vmin.f32 %v483_v15, 15.0  ;;  %v459_v22 = vadd.f32 0.5, %v457_v18 }
  0x67   : > { %v466_v39 = vfloor.f32 %v464_v41  ;;  %v440_v43 = vmul.f32 32.0, %v438_v38  ;;  %v487_v0 = vadd.f32 0.5, %v485_v19  ;;  %v1115_v25 = vtrunc.f32 %v459_v22 }
  0x68   : > { %1099 = vmatmul.mubr.msk.bf16.gmra.mxu0 %vm678_vm13, %v1168_v26  ;;  %1101 = vmatmul.mubr.msk.bf16.gmra.mxu1 %vm678_vm13, %v1169_v27  ;;  %v428_v27 = vsub.f32 %v1344_v50, %v424_v1 }
  0x69   : > { %v468_v45 = vmul.f32 32.0, %v466_v39  ;;  %v442_v48 = vsub.f32 %v424_v1, %v440_v43  ;;  %v1119_v26 = vtrunc.f32 %v487_v0  ;;  %v1116_v33 = vcvt.f32.s32 %v1115_v25 }
  0x6a   : > { %v430_v36 = vsub.f32 1.0, %v428_v27  ;;  %v583_v29 = vrot.slane %v428_v27, %v1308_v5  ;;  %v563_v1 = vrot.slane %v431_v44, %v1308_v5 }
  0x6b   : > { %v470_v55 = vsub.f32 %v462_v35, %v468_v45  ;;  %v444_v58 = vmax.f32 %v442_v48, 0.0  ;;  %v1120_v35 = vcvt.f32.s32 %v1119_v26  ;;  %v551_v37 = vrot.slane %v1116_v33, %v1308_v5 }
  0x6c   : > { %v559_v50 = vrot.slane %v430_v36, %v1308_v5 }
  0x6d   : > { %v472_v49 = vmax.f32 %v470_v55, 0.0  ;;  %v446_v53 = vmin.f32 %v444_v58, 31.0  ;;  %v575_v38 = vrot.slane %v1120_v35, %v1308_v5  ;;  %vm553_vm7 = vcmp.eq.s32.totalorder %v1295_v3, %v551_v37 }
  0x6e   : > { %vm555_vm9 = vcmp.eq.s32.totalorder %v1367_v59, %v551_v37  ;;  %v565_v45 = vsel %vm553_vm7, %v563_v1, 0.0 }
  0x6f   : > { %v474_v60 = vmin.f32 %v472_v49, 31.0  ;;  %v450_v63 = vsub.f32 31.0, %v446_v53  ;;  %vm448_vm14 = vcmp.ge.f32.partialorder %v446_v53, 16.0  ;;  %vm577_vm8 = vcmp.eq.s32.totalorder %v1295_v3, %v575_v38 }
  0x70   : > { %vm579_vm10 = vcmp.eq.s32.totalorder %v1367_v59, %v575_v38  ;;  %v589_v46 = vsel %vm577_vm8, %v587_v34, 0.0  ;;  %v567_v48 = vsel %vm555_vm9, %v563_v1, 0.0 }
  0x71   : > { %v478_v2 = vsub.f32 31.0, %v474_v60  ;;  %vm476_vm15 = vcmp.ge.f32.partialorder %v474_v60, 16.0  ;;  %v452_v7 = vsel %vm448_vm14, %v450_v63, %v446_v53  ;;  %v591_v55 = vsel %vm579_vm10, %v587_v34, 0.0 }
  0x72   : > { %v454_v12 = vmax.f32 %v452_v7, 0.0  ;;  %v593_v58 = vadd.f32 %v589_v46, %v565_v45 }
  0x73   : > { %v480_v8 = vsel %vm476_vm15, %v478_v2, %v474_v60 }
  0x74   : > { %v482_v13 = vmax.f32 %v480_v8, 0.0  ;;  %v456_v16 = vmin.f32 %v454_v12, 15.0 }
  0x76   : > { %v484_v17 = vmin.f32 %v482_v13, 15.0  ;;  %v458_v20 = vadd.f32 0.5, %v456_v16 }
  0x78   : > { %v486_v21 = vadd.f32 0.5, %v484_v17  ;;  %v1113_v23 = vtrunc.f32 %v458_v20 }
  0x7a   : > { %v1117_v24 = vtrunc.f32 %v486_v21  ;;  %v1114_v28 = vcvt.f32.s32 %v1113_v23 }
  0x7c   : > { %v1118_v31 = vcvt.f32.s32 %v1117_v24  ;;  %v547_v30 = vrot.slane %v1114_v28, %v1308_v5 }
  0x7e   : > { %v571_v41 = vrot.slane %v1118_v31, %v1308_v5  ;;  %vm552_vm3 = vcmp.eq.s32.totalorder %v1295_v3, %v547_v30  ;;  %vm554_vm5 = vcmp.eq.s32.totalorder %v1367_v59, %v547_v30 }
  0x7f   : > { %v564_v39 = vsel %vm552_vm3, %v559_v50, 0.0  ;;  %v566_v42 = vsel %vm554_vm5, %v559_v50, 0.0 }
  0x80   : > { %vm576_vm4 = vcmp.eq.s32.totalorder %v1295_v3, %v571_v41  ;;  %vm578_vm6 = vcmp.eq.s32.totalorder %v1367_v59, %v571_v41  ;;  %v595_v3 = vadd.f32 %v591_v55, %v567_v48 }
  0x81   : > { %v588_v40 = vsel %vm576_vm4, %v583_v29, 0.0  ;;  %v590_v43 = vsel %vm578_vm6, %v583_v29, 0.0 }
  0x82   : > { %v592_v56 = vadd.f32 %v588_v40, %v564_v39  ;;  %v594_v57 = vadd.f32 %v590_v43, %v566_v42 }
 0x120   : > { %v725_v47 = vpop.f32.mrf.mxu0  ;;  %v745_v5 = vpop.f32.mrf.mxu1 }
 0x121   : > { %v764_v60 = vmul.f32 %v725_v47, %v592_v56  ;;  %v839_v59 = vmul.f32 %v745_v5, %v592_v56 }
 0x122   : > { %v727_v49 = vpop.f32.mrf.mxu0  ;;  %v747_v51 = vpop.f32.mrf.mxu1 }
 0x123   : > { %v765_v63 = vmul.f32 %v727_v49, %v593_v58  ;;  %v840_v2 = vmul.f32 %v747_v51, %v593_v58 }
 0x124   : > { %v729_v52 = vpop.f32.mrf.mxu0  ;;  %v749_v53 = vpop.f32.mrf.mxu1 }
 0x125   : > { %v766_v61 = vmul.f32 %v729_v52, %v594_v57  ;;  %v841_v62 = vmul.f32 %v749_v53, %v594_v57 }
 0x126   : > { %v731_v4 = vpop.f32.mrf.mxu0  ;;  %v751_v6 = vpop.f32.mrf.mxu1 }
 0x127   : > { %v768_v7 = vadd.f32 %v766_v61, %v764_v60  ;;  %v843_v8 = vadd.f32 %v841_v62, %v839_v59  ;;  %v767_v9 = vmul.f32 %v731_v4, %v595_v3  ;;  %v842_v11 = vmul.f32 %v751_v6, %v595_v3 }
 0x128   : > { %v735_v12 = vpop.f32.mrf.mxu0  ;;  %v755_v13 = vpop.f32.mrf.mxu1 }
 0x129   : > { %v769_v14 = vrot.slane %v768_v7, 4  ;;  %v844_v15 = vrot.slane %v843_v8, 4  ;;  %v775_v16 = vadd.f32 %v767_v9, %v765_v63  ;;  %v850_v17 = vadd.f32 %v842_v11, %v840_v2 }
 0x12a   : > { %v737_v18 = vpop.f32.mrf.mxu0  ;;  %v757_v19 = vpop.f32.mrf.mxu1  ;;  %v801_v23 = vmul.f32 %v735_v12, %v592_v56  ;;  %v877_v24 = vmul.f32 %v755_v13, %v592_v56 }
 0x12b   : > { %v770_v20 = vadd.f32 %v769_v14, %v768_v7  ;;  %v845_v21 = vadd.f32 %v844_v15, %v843_v8  ;;  %v776_v22 = vrot.slane %v775_v16, 4  ;;  %v851_v0 = vrot.slane %v850_v17, 4 }
 0x12c   : > { %v739_v25 = vpop.f32.mrf.mxu0  ;;  %v759_v26 = vpop.f32.mrf.mxu1  ;;  %v802_v33 = vmul.f32 %v737_v18, %v593_v58  ;;  %v878_v35 = vmul.f32 %v757_v19, %v593_v58 }
 0x12d   : > { %v771_v27 = vrot.slane %v770_v20, 2  ;;  %v846_v28 = vrot.slane %v845_v21, 2  ;;  %v777_v31 = vadd.f32 %v776_v22, %v775_v16  ;;  %v852_v32 = vadd.f32 %v851_v0, %v850_v17 }
 0x12e   : > { %v803_v36 = vmul.f32 %v739_v25, %v594_v57  ;;  %v879_v30 = vmul.f32 %v759_v26, %v594_v57  ;;  %v741_v41 = vpop.f32.mrf.mxu0  ;;  %v761_v44 = vpop.f32.mrf.mxu1 }
 0x12f   : > { %v772_v37 = vadd.f32 %v771_v27, %v770_v20  ;;  %v847_v38 = vadd.f32 %v846_v28, %v845_v21  ;;  %v778_v50 = vrot.slane %v777_v31, 2  ;;  %v853_v29 = vrot.slane %v852_v32, 2 }
 0x130   : > { %v805_v1 = vadd.f32 %v803_v36, %v801_v23  ;;  %v881_v34 = vadd.f32 %v879_v30, %v877_v24  ;;  %v804_v39 = vmul.f32 %v741_v41, %v595_v3  ;;  %v880_v40 = vmul.f32 %v761_v44, %v595_v3 }
 0x131   : > { %v773_v42 = vrot.slane %v772_v37, 1  ;;  %v848_v43 = vrot.slane %v847_v38, 1  ;;  %v779_v45 = vadd.f32 %v778_v50, %v777_v31  ;;  %v854_v46 = vadd.f32 %v853_v29, %v852_v32 }
 0x132   : > { %v806_v47 = vrot.slane %v805_v1, 4  ;;  %v882_v5 = vrot.slane %v881_v34, 4  ;;  %v812_v48 = vadd.f32 %v804_v39, %v802_v33  ;;  %v888_v55 = vadd.f32 %v880_v40, %v878_v35 }
 0x133   : > { %v780_v56 = vrot.slane %v779_v45, 1  ;;  %v855_v57 = vrot.slane %v854_v46, 1  ;;  %v774_v53 = vadd.f32 %v773_v42, %v772_v37  ;;  %v849_v60 = vadd.f32 %v848_v43, %v847_v38 }
 0x134   : > { %v807_v58 = vadd.f32 %v806_v47, %v805_v1  ;;  %v883_v49 = vadd.f32 %v882_v5, %v881_v34  ;;  %v813_v51 = vrot.slane %v812_v48, 4  ;;  %v889_v52 = vrot.slane %v888_v55, 4 }
 0x135   : > { %v781_v59 = vadd.f32 %v780_v56, %v779_v45  ;;  %v856_v61 = vadd.f32 %v855_v57, %v854_v46 }
 0x136   : > { %v808_v3 = vrot.slane %v807_v58, 2  ;;  %v884_v62 = vrot.slane %v883_v49, 2  ;;  %v814_v63 = vadd.f32 %v813_v51, %v812_v48  ;;  %v890_v2 = vadd.f32 %v889_v52, %v888_v55 }
 0x137   : > { %v784_v4 = vcombine.low %v774_v53, %v781_v59  ;;  %v859_v6 = vcombine.low %v849_v60, %v856_v61 }
 0x138   : > { %v809_v7 = vadd.f32 %v808_v3, %v807_v58  ;;  %v885_v8 = vadd.f32 %v884_v62, %v883_v49  ;;  %v815_v9 = vrot.slane %v814_v63, 2  ;;  %v891_v11 = vrot.slane %v890_v2, 2 }
 0x139   : > { %v791_v12 = vrot.slane %v784_v4, %v1347_v54  ;;  %v866_v13 = vrot.slane %v859_v6, %v1347_v54 }
 0x13a   : > { %v810_v14 = vrot.slane %v809_v7, 1  ;;  %v886_v15 = vrot.slane %v885_v8, 1  ;;  %v816_v16 = vadd.f32 %v815_v9, %v814_v63  ;;  %v892_v17 = vadd.f32 %v891_v11, %v890_v2 }
 0x13b   : > { %v798_v18 = vrot.slane %v791_v12, %v1347_v54  ;;  %v873_v19 = vrot.slane %v866_v13, %v1347_v54 }
 0x13c   : > { %v817_v20 = vrot.slane %v816_v16, 1  ;;  %v893_v21 = vrot.slane %v892_v17, 1  ;;  %v811_v22 = vadd.f32 %v810_v14, %v809_v7  ;;  %v887_v0 = vadd.f32 %v886_v15, %v885_v8 }
 0x13d   : > { %800 = vst.msk [vmem:[%s283_s5] ss:$4 sm:$0x3] %vm1359_vm0, %v798_v18  ;;  %1103 = vst.msk [vmem:[%s283_s5 + $0x2] ss:$4 sm:$0x3] %vm1359_vm0, %v873_v19 }
 0x13e   : > { %v818_v23 = vadd.f32 %v817_v20, %v816_v16  ;;  %v894_v24 = vadd.f32 %v893_v21, %v892_v17 }
 0x140   : > { %v821_v25 = vcombine.low %v811_v22, %v818_v23  ;;  %v897_v26 = vcombine.low %v887_v0, %v894_v24 }
 0x142   : > { %v828_v27 = vrot.slane %v821_v25, %v1347_v54  ;;  %v904_v28 = vrot.slane %v897_v26, %v1347_v54 }
 0x144   : > { %v835_v31 = vrot.slane %v828_v27, %v1347_v54  ;;  %v911_v32 = vrot.slane %v904_v28, %v1347_v54 }
 0x146   : > { %1102 = vst.msk [vmem:[%s283_s5 + $0x1] ss:$4 sm:$0x3] %vm1359_vm0, %v835_v31  ;;  %1104 = vst.msk [vmem:[%s283_s5 + $0x3] ss:$4 sm:$0x3] %vm1359_vm0, %v911_v32 }
 0x147 PF: > { %s16_s17 = sadd.s32 1, %s1211_s17   ;;  %s1462_s15 = smov %s1207_s16 }
 0x148   : > { %p13_p2 = scmp.ge.s32.totalorder %s16_s17, 4   ;;  %s1463_s16 = smov %s1465_s19 }
 0x14a   :  { %15 = sbr.rel (!%p13_p2) target bundleno = 2 (0x2), region = 87 }
 0x14f   :  { %970 = vsyncpa [#allocation3], 1 }
 0x150   :  { %972 = vsyncpa [#allocation3 + $0x1], 1 }

// kernel: _lambda_.4
= control target key start
LH: loop header
LB: loop body
LE: loop exit
PB: predicated region body
PF: predicated region fallthrough
CT: control target
= control target key end

     0   :  { %s1197_s6 = smov 0   ;;  %s1477_s0 = inlined_call_operand.vmem [shape: f32[2,2,1,256], index: 0, kind: input, shape index: {}]   ;;  %s1478_s1 = inlined_call_operand.vmem [shape: f32[2,2,1,256], index: 1, kind: output, shape index: {}]  }
   0x1 LB: > { %s990_s7 = sadd.s32 4294967295, %s1172_s6   ;;  %p994_p0 = scmp.ge.s32.totalorder %s1172_s6, 1  ;;  %s1172_s6 = sphi %s1197_s6, %s11_s6  }
   0x2   : > { %p86_p1 = scmp.lt.s32.totalorder %s1172_s6, 3 }
   0x4   : > { %p87_p2 = pnand %p994_p0, %p86_p1 }
   0x5   : > { %p104_p3 = scmp.lt.s32.totalorder (!%p87_p2), %s990_s7, 1  ;;  %s1224_s15 = smov (!%p87_p2), 0  }
   0x6   : > { %90 = sbr.rel (%p87_p2) target bundleno = 416 (0x1a0), region = 24 }
   0xb   : > { %s1498_s7 = smov (!%p104_p3, %s990_s7), 1  ;;  %v117_v0 = vlaneseq }
   0xc   : > { %s995_s8 = sshll.u32 %s1498_s7, 2 }
   0xd   : > { %s107_s11 = scalar_lea.vmem %s1477_s0, %s995_s8  ;;  %s1211_s14 = scalar_lea.vmem %s1478_s1, %s995_s8  ;;  %vm1214_vm0 = vcmp.lt.s32.totalorder %v117_v0, 256 }
   0xe   : > { %v113_v1 = vld [vmem:[%s107_s11] sm:$0x3]  ;;  %v114_v3 = vld [vmem:[%s107_s11 + $0x2] sm:$0x3] }
   0xf   : > { %v115_v4 = vmul.f32 0.00390625, %v113_v1  ;;  %v116_v5 = vmul.f32 0.00390625, %v114_v3 }
  0x11   : > { %121 = vst.msk [vmem:[%s1211_s14] sm:$0x3] %vm1214_vm0, %v115_v4  ;;  %122 = vst.msk [vmem:[%s1211_s14 + $0x2] sm:$0x3] %vm1214_vm0, %v116_v5 }
  0x12 LB: >> { %s1178_s16 = smov 64   ;;  %s1179_s17 = smov 96   ;;  %vm131_vm1 = vcmask 122880   ;;  %vm132_vm2 = vsmask.f32 256  ;;  %vm241_vm12 = vcmask 124930   ;;  %s1176_s15 = sphi %s1224_s15, %s128_s15  }
  0x13   : >> { %s1180_s18 = smov 32   ;;  %vm1277_vm3 = vmand %vm131_vm1, %vm132_vm2  ;;  %s1181_s19 = smov 80   ;;  %vm242_vm13 = vsmask.f32 2304  ;;  %vm182_vm14 = vcmask 123905  }
  0x14   : >> { %s1182_s20 = smov 112   ;;  %s1184_s21 = smov 16   ;;  %vm183_vm15 = vsmask.f32 1280  ;;  %vm1343_vm2 = vmand %vm241_vm12, %vm242_vm13 }
  0x15   : >> { %s1185_s22 = smov 48   ;;  %s128_s15 = sadd.s32 1, %s1176_s15  }
  0x16   : >> { %p125_p4 = scmp.ge.s32.totalorder %s128_s15, 8  }
  0x18   : >> { %v232_v6 = vld [vmem:[%s1211_s14] sm:$0x1]  ;;  %v1008_v10 = vld [vmem:[%s1211_s14 + $0x2] sm:$0x1]  ;;  %v1024_v22 = vld [vmem:[%s1211_s14 + $0x3] sm:$0x1] }
  0x19   : >> { %v173_v7 = vld [vmem:[%s1211_s14] sm:$0x1]  ;;  %v1055_v8 = vpack.c.bf16 %v232_v6, %v232_v6  ;;  %v1002_v11 = vld [vmem:[%s1211_s14 + $0x2] sm:$0x1]  ;;  %v1056_v12 = vpack.c.bf16 %v1008_v10, %v1008_v10  ;;  %v388_v23 = vld [vmem:[%s1211_s14 + $0x1] sm:$0x1]  ;;  %v1066_v30 = vpack.c.bf16 %v1024_v22, %v1024_v22 }
  0x1a   : >> { %v1051_v9 = vpack.c.bf16 %v173_v7, %v173_v7  ;;  %v1052_v13 = vpack.c.bf16 %v1002_v11, %v1002_v11  ;;  %v1014_v14 = vld [vmem:[%s1211_s14 + $0x2] sm:$0x1]  ;;  %v291_v15 = vld [vmem:[%s1211_s14] sm:$0x1]  ;;  %v1065_v31 = vpack.c.bf16 %v388_v23, %v388_v23  ;;  %v1030_v32 = vld [vmem:[%s1211_s14 + $0x3] sm:$0x1] }
  0x1b   : >> { %v237_v16 = vrot.slane %v1055_v8, 6  ;;  %v252_v18 = vrot.slane %v1056_v12, 6  ;;  %v1060_v20 = vpack.c.bf16 %v1014_v14, %v1014_v14  ;;  %v1059_v21 = vpack.c.bf16 %v291_v15, %v291_v15  ;;  %v200_v24 = vld [vmem:[%s1211_s14] sm:$0x1]  ;;  %v1005_v25 = vld [vmem:[%s1211_s14 + $0x2] sm:$0x1] }
  0x1c   : >> { %v178_v17 = vrot.slane %v1051_v9, 7  ;;  %v193_v19 = vrot.slane %v1052_v13, 7  ;;  %v318_v26 = vld [vmem:[%s1211_s14] sm:$0x1]  ;;  %v1017_v27 = vld [vmem:[%s1211_s14 + $0x2] sm:$0x1]  ;;  %v1053_v34 = vpack.c.bf16 %v200_v24, %v200_v24  ;;  %v1054_v35 = vpack.c.bf16 %v1005_v25, %v1005_v25 }
  0x1d   : >> { %238 = vrot.lane.b32.xlu1 %v237_v16, %s1178_s16  ;;  %v311_v28 = vrot.slane %v1060_v20, 5  ;;  %v296_v29 = vrot.slane %v1059_v21, 5  ;;  %v442_v33 = vld [vmem:[%s1211_s14 + $0x1] sm:$0x1]  ;;  %v143_v36 = vld [vmem:[%s1211_s14] sm:$0x1]  ;;  %v1061_v38 = vpack.c.bf16 %v318_v26, %v318_v26  ;;  %v1062_v39 = vpack.c.bf16 %v1017_v27, %v1017_v27 }
  0x1e   : >> { %179 = vrot.lane.b32.xlu0 %v178_v17, %s1179_s17  ;;  %v999_v37 = vld [vmem:[%s1211_s14 + $0x2] sm:$0x1]  ;;  %v259_v40 = vld [vmem:[%s1211_s14] sm:$0x1]  ;;  %v1070_v42 = vpack.c.bf16 %v1030_v32, %v1030_v32  ;;  %v1069_v43 = vpack.c.bf16 %v442_v33, %v442_v33  ;;  %v1036_v44 = vld [vmem:[%s1211_s14 + $0x3] sm:$0x1]  ;;  %v1049_v48 = vpack.c.bf16 %v143_v36, %v143_v36 }
  0x1f   : >> { %v1011_v41 = vld [vmem:[%s1211_s14 + $0x2] sm:$0x1]  ;;  %v496_v45 = vld [vmem:[%s1211_s14 + $0x1] sm:$0x1]  ;;  %v405_v46 = vrot.slane %v1066_v30, 7  ;;  %v393_v47 = vrot.slane %v1065_v31, 7  ;;  %v1050_v49 = vpack.c.bf16 %v999_v37, %v999_v37  ;;  %v1057_v54 = vpack.c.bf16 %v259_v40, %v259_v40 }
  0x20   : >> { %v412_v50 = vld [vmem:[%s1211_s14 + $0x1] sm:$0x1]  ;;  %v1027_v51 = vld [vmem:[%s1211_s14 + $0x3] sm:$0x1]  ;;  %v206_v52 = vshll.u32 %v1053_v34, 16  ;;  %v223_v53 = vshll.u32 %v1054_v35, 16  ;;  %v1058_v55 = vpack.c.bf16 %v1011_v41, %v1011_v41  ;;  %v1074_v58 = vpack.c.bf16 %v1036_v44, %v1036_v44 }
  0x21   : >> { %253 = vrot.lane.b32.xlu1 %v252_v18, %s1178_s16  ;;  %v324_v56 = vshll.u32 %v1061_v38, 16  ;;  %v341_v57 = vshll.u32 %v1062_v39, 16  ;;  %v1073_v59 = vpack.c.bf16 %v496_v45, %v496_v45  ;;  %v1067_v60 = vpack.c.bf16 %v412_v50, %v412_v50  ;;  %v360_v4 = vld [vmem:[%s1211_s14 + $0x1] sm:$0x1]  ;;  %v1021_v11 = vld [vmem:[%s1211_s14 + $0x3] sm:$0x1] }
  0x22   : >> { %194 = vrot.lane.b32.xlu0 %v193_v19, %s1179_s17  ;;  %v1068_v61 = vpack.c.bf16 %v1027_v51, %v1027_v51  ;;  %v459_v62 = vrot.slane %v1070_v42, 6  ;;  %v447_v63 = vrot.slane %v1069_v43, 6  ;;  %v149_v1 = vshll.u32 %v1049_v48, 16  ;;  %v520_v12 = vld [vmem:[%s1211_s14 + $0x1] sm:$0x1] }
  0x23   : >> { %v165_v3 = vshll.u32 %v1050_v49, 16  ;;  %v208_v5 = vrot.slane %v206_v52, 7  ;;  %v225_v6 = vrot.slane %v223_v53, 7  ;;  %v265_v7 = vshll.u32 %v1057_v54, 16  ;;  %v1039_v16 = vld [vmem:[%s1211_s14 + $0x3] sm:$0x1] }
  0x24   : >> { %v282_v8 = vshll.u32 %v1058_v55, 16  ;;  %v326_v9 = vrot.slane %v324_v56, 5  ;;  %v343_v10 = vrot.slane %v341_v57, 5  ;;  %v418_v13 = vshll.u32 %v1067_v60, 16  ;;  %v466_v19 = vld [vmem:[%s1211_s14 + $0x1] sm:$0x1] }
  0x25   : >> { %312 = vrot.lane.b32.xlu1 %v311_v28, %s1180_s18  ;;  %v433_v14 = vshll.u32 %v1068_v61, 16  ;;  %v1063_v15 = vpack.c.bf16 %v360_v4, %v360_v4  ;;  %v513_v17 = vrot.slane %v1074_v58, 5  ;;  %v501_v18 = vrot.slane %v1073_v59, 5  ;;  %v1033_v24 = vld [vmem:[%s1211_s14 + $0x3] sm:$0x1] }
  0x26   : >> { %297 = vrot.lane.b32.xlu0 %v296_v29, %s1180_s18  ;;  %v267_v20 = vrot.slane %v265_v7, 6  ;;  %v284_v21 = vrot.slane %v282_v8, 6  ;;  %v1064_v22 = vpack.c.bf16 %v1021_v11, %v1021_v11  ;;  %v1075_v23 = vpack.c.bf16 %v520_v12, %v520_v12  ;;  %v129_v34 = vld [vmem:[%s1211_s14] sm:$0x1]  ;;  %v997_v41 = vld [vmem:[%s1211_s14 + $0x2] sm:$0x1] }
  0x27   : >> { %v1125_v25 = vpack.i.bf16 %v225_v6, %v208_v5  ;;  %v1120_v26 = vpack.i.bf16 %v165_v3, %v149_v1  ;;  %v1135_v27 = vpack.i.bf16 %v343_v10, %v326_v9  ;;  %v1076_v28 = vpack.c.bf16 %v1039_v16, %v1039_v16  ;;  %v134_v40 = vld [vmem:[#allocation2] sm:$0x1]  ;;  %v140_v45 = vld [vmem:[#allocation2 + $0x8] sm:$0x1]  ;;  %v352_v52 = vld [vmem:[#allocation2 + $0x4] sm:$0x1] }
  0x28   : >> { %v420_v29 = vrot.slane %v418_v13, 7  ;;  %v435_v30 = vrot.slane %v433_v14, 7  ;;  %v1267_v31 = vshll.u32 %v1063_v15, 16  ;;  %v1071_v32 = vpack.c.bf16 %v466_v19, %v466_v19  ;;  %v1019_v53 = vld [vmem:[%s1211_s14 + $0x3] sm:$0x1] }
  0x29   : >> { %406 = vrot.lane.b32.xlu1 %v405_v46, %s1179_s17  ;;  %v1072_v33 = vpack.c.bf16 %v1033_v24, %v1033_v24  ;;  %v1273_v35 = vand.u32 127, %v117_v0  ;;  %v1130_v36 = vpack.i.bf16 %v284_v21, %v267_v20  ;;  %v380_v37 = vshll.u32 %v1064_v22, 16  ;;  %v350_v46 = vld [vmem:[%s1211_s14 + $0x1] sm:$0x1]  ;;  %v357_v58 = vld [vmem:[#allocation2 + $0xc] sm:$0x1] }
  0x2a   : >> { %394 = vrot.lane.b32.xlu0 %v393_v47, %s1179_s17  ;;  %v526_v38 = vshll.u32 %v1075_v23, 16  ;;  %v130_v39 = vpack.c.bf16 %v129_v34, %v129_v34  ;;  %v541_v42 = vshll.u32 %v1076_v28, 16  ;;  %v139_v44 = vpack.c.bf16 %v997_v41, %v997_v41  ;;  %v1307_v12 = vld [vmem:[%s1211_s14 + $0x2] sm:$0x3] }
  0x2b   : >> { %v552_v47 = vadd.s32 128, %v1273_v35  ;;  %v553_v48 = vcvt.s32.f32 %v1273_v35  ;;  %v472_v49 = vshll.u32 %v1071_v32, 16  ;;  %v351_v51 = vpack.c.bf16 %v350_v46, %v350_v46 }
  0x2c   : >> { %v135_v50 = vsel %vm1277_vm3, %v130_v39, %v134_v40  ;;  %v1288_v54 = vshrl.u32 %v117_v0, 7  ;;  %v487_v55 = vshll.u32 %v1072_v33, 16  ;;  %v141_v56 = vsel %vm1277_vm3, %v139_v44, %v140_v45 }
  0x2d   : >> { %460 = vrot.lane.b32.xlu1 %v459_v62, %s1178_s16  ;;  %136 = vst [vmem:[#allocation2] sm:$0x1] %v135_v50  ;;  %v356_v57 = vpack.c.bf16 %v1019_v53, %v1019_v53  ;;  %v554_v59 = vcvt.s32.f32 %v552_v47  ;;  %v1145_v60 = vpack.i.bf16 %v435_v30, %v420_v29  ;;  %142 = vst [vmem:[#allocation2 + $0x8] sm:$0x1] %v141_v56  ;;  %v555_v62 = vadd.f32 0.5, %v553_v48 }
  0x2e   : >> { %448 = vrot.lane.b32.xlu0 %v447_v63, %s1178_s16  ;;  %v353_v61 = vsel %vm1277_vm3, %v351_v51, %v352_v52  ;;  %v1140_v63 = vpack.i.bf16 %v380_v37, %v1267_v31  ;;  %v528_v4 = vrot.slane %v526_v38, 5  ;;  %v543_v5 = vrot.slane %v541_v42, 5 }
  0x2f   : >> { %354 = vst [vmem:[#allocation2 + $0x4] sm:$0x1] %v353_v61  ;;  %v358_v1 = vsel %vm1277_vm3, %v356_v57, %v357_v58  ;;  %v556_v3 = vadd.f32 0.5, %v554_v59  ;;  %v1300_v6 = vsub.s32 0, %v1288_v54  ;;  %v1302_v7 = vmul.f32 0.0625, %v555_v62  ;;  %vm1348_vm3 = vmand %vm182_vm14, %vm183_vm15 }
  0x30   : >> { %359 = vst [vmem:[#allocation2 + $0xc] sm:$0x1] %v358_v1  ;;  %v1183_v8 = vmov 0   ;;  %v474_v9 = vrot.slane %v472_v49, 6  ;;  %v489_v10 = vrot.slane %v487_v55, 6  ;;  %v574_v13 = vsub.s32 1, %v1288_v54 }
  0x31   : >> { %514 = vrot.lane.b32.xlu1 %v513_v17, %s1180_s18  ;;  %835 = vmatprep.mubr.bf16.mxu0 %v1183_v8  ;;  %v1304_v11 = vmul.f32 0.0625, %v556_v3  ;;  %v559_v14 = vfloor.f32 %v1302_v7  ;;  %v584_v17 = vrot.slane %v1307_v12, %v1300_v6  ;;  %v1324_v3 = vadd.s32 8, %v1288_v54 }
  0x32   : >> { %502 = vrot.lane.b32.xlu0 %v501_v18, %s1180_s18  ;;  %845 = vmatprep.mubr.bf16.mxu1 %v1183_v8  ;;  %v1155_v18 = vpack.i.bf16 %v543_v5, %v528_v4  ;;  %v1150_v19 = vpack.i.bf16 %v489_v10, %v474_v9  ;;  %v588_v21 = vrot.slane %v1307_v12, %v574_v13 }
  0x33   : >> { %v560_v15 = vfloor.f32 %v1304_v11  ;;  %v561_v16 = vmul.f32 16.0, %v559_v14 }
  0x35   : >> { %1126 = vrot.lane.b32.xlu1 %v1125_v25, %s1181_s19  ;;  %v562_v20 = vmul.f32 16.0, %v560_v15  ;;  %v563_v22 = vsub.f32 %v553_v48, %v561_v16 }
  0x36   : >> { %1121 = vrot.lane.b32.xlu0 %v1120_v26, %s1182_s20 }
  0x37   : >> { %v564_v23 = vsub.f32 %v554_v59, %v562_v20  ;;  %v591_v24 = vadd.f32 %v584_v17, %v563_v22 }
  0x39   : >> { %1136 = vrot.lane.b32.xlu1 %v1135_v27, %s1184_s21  ;;  %v592_v25 = vadd.f32 %v588_v21, %v564_v23  ;;  %v598_v26 = vfloor.f32 %v591_v24 }
  0x3a   : >> { %1131 = vrot.lane.b32.xlu0 %v1130_v36, %s1185_s22 }
  0x3b   : >> { %v599_v27 = vfloor.f32 %v592_v25  ;;  %v642_v28 = vmul.f32 0.0625, %v598_v26  ;;  %v658_v29 = vadd.f32 1.0, %v598_v26  ;;  %v604_v48 = vsub.f32 %v591_v24, %v598_v26 }
  0x3d   : >> { %1146 = vrot.lane.b32.xlu1 %v1145_v60, %s1181_s19  ;;  %v643_v30 = vmul.f32 0.0625, %v599_v27  ;;  %v659_v31 = vadd.f32 1.0, %v599_v27  ;;  %v644_v32 = vfloor.f32 %v642_v28  ;;  %v660_v33 = vmul.f32 0.0625, %v658_v29 }
  0x3e   : >> { %1141 = vrot.lane.b32.xlu0 %v1140_v63, %s1182_s20  ;;  %v605_v49 = vsub.f32 %v592_v25, %v599_v27  ;;  %v606_v59 = vsub.f32 1.0, %v604_v48  ;;  %v767_v21 = vrot.slane %v604_v48, %v1300_v6  ;;  %v197_v48 = vld [vmem:[#allocation2 + $0x8] sm:$0x2] }
  0x3f   : >> { %v645_v34 = vfloor.f32 %v643_v30  ;;  %v661_v35 = vmul.f32 0.0625, %v659_v31  ;;  %v646_v36 = vmul.f32 16.0, %v644_v32  ;;  %v662_v37 = vfloor.f32 %v660_v33 }
  0x40   : >> { %v607_v60 = vsub.f32 1.0, %v605_v49  ;;  %v743_v10 = vrot.slane %v606_v59, %v1300_v6  ;;  %v771_v22 = vrot.slane %v605_v49, %v1300_v6 }
  0x41   : >> { %1156 = vrot.lane.b32.xlu1 %v1155_v18, %s1184_s21  ;;  %v647_v38 = vmul.f32 16.0, %v645_v34  ;;  %v663_v39 = vfloor.f32 %v661_v35  ;;  %v648_v40 = vsub.f32 %v598_v26, %v646_v36  ;;  %v664_v41 = vmul.f32 16.0, %v662_v37 }
  0x42   : >> { %1151 = vrot.lane.b32.xlu0 %v1150_v19, %s1185_s22  ;;  %v747_v16 = vrot.slane %v607_v60, %v1300_v6 }
  0x43   : >> { %v649_v42 = vsub.f32 %v599_v27, %v647_v38  ;;  %v665_v43 = vmul.f32 16.0, %v663_v39  ;;  %v650_v44 = vmax.f32 %v648_v40, 0.0  ;;  %v666_v45 = vsub.f32 %v658_v29, %v664_v41  ;;  %v244_v40 = vld [vmem:[#allocation2] sm:$0x4] }
  0x45   : >> { %v651_v46 = vmax.f32 %v649_v42, 0.0  ;;  %v667_v47 = vsub.f32 %v659_v31, %v665_v43  ;;  %v652_v50 = vmin.f32 %v650_v44, 15.0  ;;  %v668_v51 = vmax.f32 %v666_v45, 0.0  ;;  %v185_v42 = vld [vmem:[#allocation2] sm:$0x2] }
  0x47   : >> { %v653_v52 = vmin.f32 %v651_v46, 15.0  ;;  %v669_v53 = vmax.f32 %v667_v47, 0.0  ;;  %v654_v55 = vadd.f32 0.5, %v652_v50  ;;  %v670_v56 = vmin.f32 %v668_v51, 15.0  ;;  %v256_v47 = vld [vmem:[#allocation2 + $0x8] sm:$0x4] }
  0x49   : >> { %v655_v57 = vadd.f32 0.5, %v653_v52  ;;  %v671_v58 = vmin.f32 %v669_v53, 15.0  ;;  %v1087_v61 = vtrunc.f32 %v654_v55  ;;  %v672_v62 = vadd.f32 0.5, %v670_v56  ;;  %v315_v55 = vld [vmem:[#allocation2 + $0x8] sm:$0x8] }
  0x4a   : >> { %v303_v56 = vld [vmem:[#allocation2] sm:$0x8] }
  0x4b   : >> { %v1089_v63 = vtrunc.f32 %v655_v57  ;;  %v673_v1 = vadd.f32 0.5, %v671_v58  ;;  %v1088_v4 = vcvt.f32.s32 %v1087_v61  ;;  %v1091_v5 = vtrunc.f32 %v672_v62  ;;  %v409_v61 = vld [vmem:[#allocation2 + $0xc] sm:$0x2]  ;;  %v397_v62 = vld [vmem:[#allocation2 + $0x4] sm:$0x2] }
  0x4d   : >> { %v1090_v8 = vcvt.f32.s32 %v1089_v63  ;;  %v1093_v9 = vtrunc.f32 %v673_v1  ;;  %v1092_v17 = vcvt.f32.s32 %v1091_v5  ;;  %v731_v18 = vrot.slane %v1088_v4, %v1300_v6 }
  0x4f   : >> { %v1094_v19 = vcvt.f32.s32 %v1093_v9  ;;  %v735_v20 = vrot.slane %v1090_v8, %v1300_v6  ;;  %vm736_vm4 = vcmp.eq.s32.totalorder %v1288_v54, %v731_v18  ;;  %vm738_vm5 = vcmp.eq.s32.totalorder %v1324_v3, %v731_v18  ;;  %v463_v8 = vld [vmem:[#allocation2 + $0xc] sm:$0x4]  ;;  %v451_v9 = vld [vmem:[#allocation2 + $0x4] sm:$0x4] }
  0x50   : >> { %v755_v23 = vrot.slane %v1092_v17, %v1300_v6  ;;  %v748_v25 = vsel %vm736_vm4, %v743_v10, 0.0  ;;  %v750_v28 = vsel %vm738_vm5, %v743_v10, 0.0  ;;  %vm300_vm4 = vcmask 125955  }
  0x51   : >> { %vm737_vm6 = vcmp.eq.s32.totalorder %v1288_v54, %v735_v20  ;;  %vm739_vm7 = vcmp.eq.s32.totalorder %v1324_v3, %v735_v20  ;;  %v759_v24 = vrot.slane %v1094_v19, %v1300_v6  ;;  %vm301_vm5 = vsmask.f32 3328  ;;  %v517_v19 = vld [vmem:[#allocation2 + $0xc] sm:$0x8]  ;;  %v505_v20 = vld [vmem:[#allocation2 + $0x4] sm:$0x8] }
  0x52   : >> { %v749_v26 = vsel %vm737_vm6, %v747_v16, 0.0  ;;  %v751_v27 = vsel %vm739_vm7, %v747_v16, 0.0  ;;  %vm760_vm8 = vcmp.eq.s32.totalorder %v1288_v54, %v755_v23  ;;  %vm762_vm11 = vcmp.eq.s32.totalorder %v1324_v3, %v755_v23  ;;  %vm1361_vm6 = vmand %vm300_vm4, %vm301_vm5 }
  0x53   : >> { %vm761_vm9 = vcmp.eq.s32.totalorder %v1288_v54, %v759_v24  ;;  %vm763_vm10 = vcmp.eq.s32.totalorder %v1324_v3, %v759_v24  ;;  %v772_v29 = vsel %vm760_vm8, %v767_v21, 0.0  ;;  %v774_v32 = vsel %vm762_vm11, %v767_v21, 0.0 }
  0x54   : >> { %v773_v30 = vsel %vm761_vm9, %v771_v22, 0.0  ;;  %v775_v31 = vsel %vm763_vm10, %v771_v22, 0.0  ;;  %v776_v33 = vadd.f32 %v772_v29, %v748_v25  ;;  %v778_v36 = vadd.f32 %v774_v32, %v750_v28  ;;  %v156_v29 = vld [vmem:[#allocation2] sm:$0x1] }
  0x55   : >> { %v777_v34 = vadd.f32 %v773_v30, %v749_v26  ;;  %v779_v35 = vadd.f32 %v775_v31, %v751_v27  ;;  %vm212_vm7 = vsmask.f32 7942  ;;  %vm154_vm8 = vsmask.f32 7938  ;;  %v170_v30 = vld [vmem:[#allocation2 + $0x8] sm:$0x1] }
  0x56   : >> { %v784_v38 = vpack.c.bf16 %v778_v36, %v776_v33  ;;  %vm271_vm9 = vsmask.f32 7946  ;;  %vm1382_vm10 = vmand %vm182_vm14, %vm212_vm7  ;;  %vm330_vm11 = vsmask.f32 7950 }
  0x57   : >> { %v785_v37 = vpack.c.bf16 %v779_v35, %v777_v34  ;;  %vm1387_vm13 = vmand %vm131_vm1, %vm154_vm8 }
  0x58   : >> { %vm1392_vm14 = vmand %vm241_vm12, %vm271_vm9  ;;  %vm796_vm12 = vcmask 130048  }
  0x59   : >> { %817 = vmatprep.subr.bf16.mxu0 %v785_v37  ;;  %1077 = vmatprep.subr.bf16.mxu1 %v785_v37  ;;  %vm1406_vm1 = vmand %vm300_vm4, %vm330_vm11 }
  0x5a   : >> { %818 = vmatpush1.bf16.msra.mxu0 %v784_v38  ;;  %1078 = vmatpush1.bf16.msra.mxu1 %v784_v38 }
  0x8f   : >> { %v239_v43 = vpop.permute.xlu1 %238 }
  0x90   : >> { %v180_v44 = vpop.permute.xlu0 %179  ;;  %v245_v45 = vsel %vm1343_vm2, %v239_v43, %v244_v40 }
  0x91   : >> { %v186_v46 = vsel %vm1348_vm3, %v180_v44, %v185_v42  ;;  %246 = vst [vmem:[#allocation2] sm:$0x4] %v245_v45 }
  0x92   : >> { %187 = vst [vmem:[#allocation2] sm:$0x2] %v186_v46 }
  0x93   : >> { %v254_v49 = vpop.permute.xlu1 %253 }
  0x94   : >> { %v195_v50 = vpop.permute.xlu0 %194  ;;  %v257_v51 = vsel %vm1343_vm2, %v254_v49, %v256_v47 }
  0x95   : >> { %v198_v52 = vsel %vm1348_vm3, %v195_v50, %v197_v48  ;;  %258 = vst [vmem:[#allocation2 + $0x8] sm:$0x4] %v257_v51 }
  0x96   : >> { %199 = vst [vmem:[#allocation2 + $0x8] sm:$0x2] %v198_v52 }
  0x97   : >> { %v313_v57 = vpop.permute.xlu1 %312 }
  0x98   : >> { %v298_v58 = vpop.permute.xlu0 %297  ;;  %v316_v59 = vsel %vm1361_vm6, %v313_v57, %v315_v55  ;;  %v273_v47 = vld [vmem:[#allocation2] sm:$0x4] }
  0x99   : >> { %v304_v60 = vsel %vm1361_vm6, %v298_v58, %v303_v56  ;;  %317 = vst [vmem:[#allocation2 + $0x8] sm:$0x8] %v316_v59  ;;  %v214_v35 = vld [vmem:[#allocation2] sm:$0x2] }
  0x9a   : >> { %305 = vst [vmem:[#allocation2] sm:$0x8] %v304_v60  ;;  %v371_v60 = vld [vmem:[#allocation2 + $0x4] sm:$0x1] }
  0x9b   : >> { %v407_v63 = vpop.permute.xlu1 %406 }
  0x9c   : >> { %v395_v1 = vpop.permute.xlu0 %394  ;;  %v410_v4 = vsel %vm1348_vm3, %v407_v63, %v409_v61  ;;  %v288_v52 = vld [vmem:[#allocation2 + $0x8] sm:$0x4]  ;;  %v385_v61 = vld [vmem:[#allocation2 + $0xc] sm:$0x1] }
  0x9d   : >> { %v398_v5 = vsel %vm1348_vm3, %v395_v1, %v397_v62  ;;  %411 = vst [vmem:[#allocation2 + $0xc] sm:$0x2] %v410_v4  ;;  %v229_v36 = vld [vmem:[#allocation2 + $0x8] sm:$0x2] }
  0x9e   : >> { %399 = vst [vmem:[#allocation2 + $0x4] sm:$0x2] %v398_v5 }
  0x9f   : >> { %v461_v10 = vpop.permute.xlu1 %460 }
  0xa0   : >> { %v449_v16 = vpop.permute.xlu0 %448  ;;  %v464_v17 = vsel %vm1343_vm2, %v461_v10, %v463_v8  ;;  %v347_v50 = vld [vmem:[#allocation2 + $0x8] sm:$0x8] }
  0xa1   : >> { %v452_v18 = vsel %vm1343_vm2, %v449_v16, %v451_v9  ;;  %465 = vst [vmem:[#allocation2 + $0xc] sm:$0x4] %v464_v17  ;;  %v332_v51 = vld [vmem:[#allocation2] sm:$0x8] }
  0xa2   : >> { %453 = vst [vmem:[#allocation2 + $0x4] sm:$0x4] %v452_v18 }
  0xa3   : >> { %v515_v21 = vpop.permute.xlu1 %514 }
  0xa4   : >> { %v503_v22 = vpop.permute.xlu0 %502  ;;  %v518_v23 = vsel %vm1361_vm6, %v515_v21, %v517_v19  ;;  %v439_v5 = vld [vmem:[#allocation2 + $0xc] sm:$0x2] }
  0xa5   : >> { %v506_v24 = vsel %vm1361_vm6, %v503_v22, %v505_v20  ;;  %519 = vst [vmem:[#allocation2 + $0xc] sm:$0x8] %v518_v23  ;;  %v424_v8 = vld [vmem:[#allocation2 + $0x4] sm:$0x2] }
  0xa6   : >> { %507 = vst [vmem:[#allocation2 + $0x4] sm:$0x8] %v506_v24 }
  0xa7   : >> { %v1127_v26 = vpop.permute.xlu1 %1126 }
  0xa8   : >> { %v1122_v27 = vpop.permute.xlu0 %1121  ;;  %v1129_v31 = vunpack.i.h.bf16 %v1127_v26  ;;  %v1128_v32 = vunpack.i.l.bf16 %v1127_v26 }
  0xa9   : >> { %v1124_v33 = vunpack.i.h.bf16 %v1122_v27  ;;  %v1123_v34 = vunpack.i.l.bf16 %v1122_v27  ;;  %v478_v22 = vld [vmem:[#allocation2 + $0x4] sm:$0x4]  ;;  %v493_v27 = vld [vmem:[#allocation2 + $0xc] sm:$0x4] }
  0xaa   : >> { %v215_v38 = vsel %vm1382_vm10, %v1128_v32, %v214_v35  ;;  %v230_v39 = vsel %vm1382_vm10, %v1129_v31, %v229_v36 }
  0xab   : >> { %v157_v40 = vsel %vm1387_vm13, %v1123_v34, %v156_v29  ;;  %v171_v41 = vsel %vm1387_vm13, %v1124_v33, %v170_v30  ;;  %216 = vst [vmem:[#allocation2] sm:$0x2] %v215_v38  ;;  %231 = vst [vmem:[#allocation2 + $0x8] sm:$0x2] %v230_v39  ;;  %v1137_v43 = vpop.permute.xlu1 %1136  ;;  %v1435_v34 = vld [vmem:[%s1211_s14] sm:$0x3] }
  0xac   : >> { %158 = vst [vmem:[#allocation2] sm:$0x1] %v157_v40  ;;  %172 = vst [vmem:[#allocation2 + $0x8] sm:$0x1] %v171_v41  ;;  %v1132_v44 = vpop.permute.xlu0 %1131  ;;  %v1139_v45 = vunpack.i.h.bf16 %v1137_v43  ;;  %v1138_v46 = vunpack.i.l.bf16 %v1137_v43  ;;  %v547_v26 = vld [vmem:[#allocation2 + $0xc] sm:$0x8]  ;;  %v571_v35 = vrot.slane %v1435_v34, %v1300_v6  ;;  %v575_v36 = vrot.slane %v1435_v34, %v574_v13 }
  0xad   : >> { %v1134_v48 = vunpack.i.h.bf16 %v1132_v44  ;;  %v1133_v49 = vunpack.i.l.bf16 %v1132_v44  ;;  %v532_v25 = vld [vmem:[#allocation2 + $0x4] sm:$0x8] }
  0xae   : >> { %v348_v53 = vsel %vm1406_vm1, %v1139_v45, %v347_v50  ;;  %v333_v55 = vsel %vm1406_vm1, %v1138_v46, %v332_v51  ;;  %v578_v37 = vadd.f32 %v571_v35, %v559_v14  ;;  %v579_v38 = vadd.f32 %v575_v36, %v560_v15 }
  0xaf   : >> { %v289_v56 = vsel %vm1392_vm14, %v1134_v48, %v288_v52  ;;  %v274_v57 = vsel %vm1392_vm14, %v1133_v49, %v273_v47  ;;  %349 = vst [vmem:[#allocation2 + $0x8] sm:$0x8] %v348_v53  ;;  %334 = vst [vmem:[#allocation2] sm:$0x8] %v333_v55  ;;  %v1147_v58 = vpop.permute.xlu1 %1146 }
  0xb0   : >> { %290 = vst [vmem:[#allocation2 + $0x8] sm:$0x4] %v289_v56  ;;  %275 = vst [vmem:[#allocation2] sm:$0x4] %v274_v57  ;;  %v1142_v59 = vpop.permute.xlu0 %1141  ;;  %v1149_v62 = vunpack.i.h.bf16 %v1147_v58  ;;  %v1148_v63 = vunpack.i.l.bf16 %v1147_v58  ;;  %v596_v39 = vfloor.f32 %v578_v37  ;;  %v597_v40 = vfloor.f32 %v579_v38 }
  0xb1   : >> { %v1144_v1 = vunpack.i.h.bf16 %v1142_v59  ;;  %v1143_v4 = vunpack.i.l.bf16 %v1142_v59 }
  0xb2   : >> { %v440_v9 = vsel %vm1382_vm10, %v1149_v62, %v439_v5  ;;  %v425_v10 = vsel %vm1382_vm10, %v1148_v63, %v424_v8  ;;  %v624_v41 = vadd.f32 1.0, %v596_v39  ;;  %v625_v42 = vadd.f32 1.0, %v597_v40 }
  0xb3   : >> { %v372_v16 = vsel %vm1387_vm13, %v1143_v4, %v371_v60  ;;  %v386_v17 = vsel %vm1387_vm13, %v1144_v1, %v385_v61  ;;  %441 = vst [vmem:[#allocation2 + $0xc] sm:$0x2] %v440_v9  ;;  %426 = vst [vmem:[#allocation2 + $0x4] sm:$0x2] %v425_v10  ;;  %v1157_v18 = vpop.permute.xlu1 %1156  ;;  %v608_v43 = vmul.f32 0.0625, %v596_v39  ;;  %v609_v45 = vmul.f32 0.0625, %v597_v40 }
  0xb4   : >> { %373 = vst [vmem:[#allocation2 + $0x4] sm:$0x1] %v372_v16  ;;  %387 = vst [vmem:[#allocation2 + $0xc] sm:$0x1] %v386_v17  ;;  %v1152_v19 = vpop.permute.xlu0 %1151  ;;  %v1159_v20 = vunpack.i.h.bf16 %v1157_v18  ;;  %v1158_v21 = vunpack.i.l.bf16 %v1157_v18  ;;  %v626_v44 = vmul.f32 0.0625, %v624_v41  ;;  %v627_v46 = vmul.f32 0.0625, %v625_v42 }
  0xb5   : >> { %v1154_v23 = vunpack.i.h.bf16 %v1152_v19  ;;  %v1153_v24 = vunpack.i.l.bf16 %v1152_v19  ;;  %v610_v47 = vfloor.f32 %v608_v43  ;;  %v611_v49 = vfloor.f32 %v609_v45 }
  0xb6   : >> { %v548_v29 = vsel %vm1406_vm1, %v1159_v20, %v547_v26  ;;  %v533_v28 = vsel %vm1406_vm1, %v1158_v21, %v532_v25  ;;  %v628_v48 = vfloor.f32 %v626_v44  ;;  %v629_v50 = vfloor.f32 %v627_v46 }
  0xb7   : >> { %v494_v30 = vsel %vm1392_vm14, %v1154_v23, %v493_v27  ;;  %v479_v31 = vsel %vm1392_vm14, %v1153_v24, %v478_v22  ;;  %549 = vst [vmem:[#allocation2 + $0xc] sm:$0x8] %v548_v29  ;;  %534 = vst [vmem:[#allocation2 + $0x4] sm:$0x8] %v533_v28  ;;  %v612_v51 = vmul.f32 16.0, %v610_v47  ;;  %v613_v52 = vmul.f32 16.0, %v611_v49 }
  0xb8   : >> { %495 = vst [vmem:[#allocation2 + $0xc] sm:$0x4] %v494_v30  ;;  %480 = vst [vmem:[#allocation2 + $0x4] sm:$0x4] %v479_v31  ;;  %v630_v13 = vmul.f32 16.0, %v628_v48  ;;  %v631_v7 = vmul.f32 16.0, %v629_v50  ;;  %v600_v17 = vsub.f32 %v578_v37, %v596_v39  ;;  %v601_v20 = vsub.f32 %v579_v38, %v597_v40 }
  0xb9   : >> { %v614_v14 = vsub.f32 %v596_v39, %v612_v51  ;;  %v615_v11 = vsub.f32 %v597_v40, %v613_v52 }
  0xba   : >> { %v632_v53 = vsub.f32 %v624_v41, %v630_v13  ;;  %v633_v15 = vsub.f32 %v625_v42, %v631_v7  ;;  %v602_v23 = vsub.f32 1.0, %v600_v17  ;;  %v603_v25 = vsub.f32 1.0, %v601_v20 }
  0xbb   : >> { %v616_v55 = vmax.f32 %v614_v14, 0.0  ;;  %v617_v57 = vmax.f32 %v615_v11, 0.0  ;;  %v715_v30 = vrot.slane %v600_v17, %v1300_v6 }
  0xbc   : >> { %v634_v56 = vmax.f32 %v632_v53, 0.0  ;;  %v635_v58 = vmax.f32 %v633_v15, 0.0  ;;  %v691_v28 = vrot.slane %v602_v23, %v1300_v6  ;;  %v695_v31 = vrot.slane %v603_v25, %v1300_v6 }
  0xbd   : >> { %v618_v59 = vmin.f32 %v616_v55, 15.0  ;;  %v619_v61 = vmin.f32 %v617_v57, 15.0 }
  0xbe   : >> { %v636_v60 = vmin.f32 %v634_v56, 15.0  ;;  %v637_v62 = vmin.f32 %v635_v58, 15.0 }
  0xbf   : >> { %v1160_v32 = vld [vmem:[#allocation2] sm:$0xff]   ;;  %v1161_v33 = vld [vmem:[#allocation2 + $0x8] sm:$0xff]   ;;  %v620_v63 = vadd.f32 0.5, %v618_v59  ;;  %v621_v4 = vadd.f32 0.5, %v619_v61 }
  0xc0   : >> { %1044 = vmatmul.mubr.msk.bf16.vlgmr.msra.gmra.mxu0 %vm796_vm12, %v1160_v32  ;;  %1045 = vmatmul.mubr.msk.bf16.vlgmr.msra.gmra.mxu1 %vm796_vm12, %v1161_v33  ;;  %v638_v1 = vadd.f32 0.5, %v636_v60  ;;  %v639_v5 = vadd.f32 0.5, %v637_v62  ;;  %v719_v32 = vrot.slane %v601_v20, %v1300_v6 }
  0xc1   : >> { %v1079_v8 = vtrunc.f32 %v620_v63  ;;  %v1081_v10 = vtrunc.f32 %v621_v4 }
  0xc2   : >> { %v1083_v9 = vtrunc.f32 %v638_v1  ;;  %v1085_v16 = vtrunc.f32 %v639_v5 }
  0xc3   : >> { %v1080_v18 = vcvt.f32.s32 %v1079_v8  ;;  %v1082_v21 = vcvt.f32.s32 %v1081_v10 }
  0xc4   : >> { %v1084_v19 = vcvt.f32.s32 %v1083_v9  ;;  %v1086_v22 = vcvt.f32.s32 %v1085_v16  ;;  %v1186_v9 = vmov 1966171168  }
  0xc5   : >> { %v679_v24 = vrot.slane %v1080_v18, %v1300_v6  ;;  %v683_v27 = vrot.slane %v1082_v21, %v1300_v6  ;;  %v896_v10 = vunpack.c.l.s4 %v1186_v9 }
  0xc6   : >> { %v703_v26 = vrot.slane %v1084_v19, %v1300_v6  ;;  %v707_v29 = vrot.slane %v1086_v22, %v1300_v6 }
  0xc7   : >> { %vm684_vm15 = vcmp.eq.s32.totalorder %v1288_v54, %v679_v24  ;;  %vm686_vm3 = vcmp.eq.s32.totalorder %v1324_v3, %v679_v24  ;;  %vm685_vm5 = vcmp.eq.s32.totalorder %v1288_v54, %v683_v27  ;;  %vm687_vm7 = vcmp.eq.s32.totalorder %v1324_v3, %v683_v27 }
  0xc8   : >> { %vm708_vm2 = vcmp.eq.s32.totalorder %v1288_v54, %v703_v26  ;;  %vm710_vm4 = vcmp.eq.s32.totalorder %v1324_v3, %v703_v26  ;;  %vm709_vm6 = vcmp.eq.s32.totalorder %v1288_v54, %v707_v29  ;;  %vm711_vm8 = vcmp.eq.s32.totalorder %v1324_v3, %v707_v29 }
  0xc9   : >> { %v696_v33 = vsel %vm684_vm15, %v691_v28, 0.0  ;;  %v720_v35 = vsel %vm708_vm2, %v715_v30, 0.0  ;;  %v698_v36 = vsel %vm686_vm3, %v691_v28, 0.0  ;;  %v722_v37 = vsel %vm710_vm4, %v715_v30, 0.0 }
  0xca   : >> { %v697_v39 = vsel %vm685_vm5, %v695_v31, 0.0  ;;  %v721_v40 = vsel %vm709_vm6, %v719_v32, 0.0  ;;  %v699_v41 = vsel %vm687_vm7, %v695_v31, 0.0  ;;  %v723_v42 = vsel %vm711_vm8, %v719_v32, 0.0 }
  0xcb   : >> { %v724_v43 = vadd.f32 %v720_v35, %v696_v33  ;;  %v726_v6 = vadd.f32 %v722_v37, %v698_v36  ;;  %v725_v46 = vadd.f32 %v721_v40, %v697_v39  ;;  %v727_v48 = vadd.f32 %v723_v42, %v699_v41 }
  0xcc   : >> { %v897_v24 = vunpack.c.0.s8 %v896_v10 }
  0xce   : >> { %v900_v31 = vsub.s32 %v897_v24, %v1288_v54 }
 0x180   : >> { %v837_v38 = vpop.f32.mrf.mxu0  ;;  %v847_v44 = vpop.f32.mrf.mxu1 }
 0x181   : >> { %v856_v50 = vmul.f32 %v837_v38, %v724_v43  ;;  %v874_v13 = vmul.f32 %v847_v44, %v724_v43 }
 0x182   : >> { %v839_v45 = vpop.f32.mrf.mxu0  ;;  %v849_v47 = vpop.f32.mrf.mxu1 }
 0x183   : >> { %v857_v14 = vmul.f32 %v839_v45, %v725_v46  ;;  %v875_v55 = vmul.f32 %v849_v47, %v725_v46 }
 0x184   : >> { %v841_v49 = vpop.f32.mrf.mxu0  ;;  %v851_v3 = vpop.f32.mrf.mxu1 }
 0x185   : >> { %v858_v51 = vmul.f32 %v841_v49, %v726_v6  ;;  %v876_v52 = vmul.f32 %v851_v3, %v726_v6 }
 0x186   : >> { %v843_v7 = vpop.f32.mrf.mxu0  ;;  %v853_v15 = vpop.f32.mrf.mxu1 }
 0x187   : >> { %v860_v53 = vadd.f32 %v858_v51, %v856_v50  ;;  %v859_v11 = vmul.f32 %v843_v7, %v727_v48  ;;  %v878_v56 = vadd.f32 %v876_v52, %v874_v13  ;;  %v877_v57 = vmul.f32 %v853_v15, %v727_v48 }
 0x189   : >> { %v861_v58 = vrot.slane %v860_v53, 4  ;;  %v867_v59 = vadd.f32 %v859_v11, %v857_v14  ;;  %v879_v60 = vrot.slane %v878_v56, 4  ;;  %v885_v61 = vadd.f32 %v877_v57, %v875_v55 }
 0x18b   : >> { %v862_v62 = vadd.f32 %v861_v58, %v860_v53  ;;  %v868_v63 = vrot.slane %v867_v59, 4  ;;  %v880_v1 = vadd.f32 %v879_v60, %v878_v56  ;;  %v886_v4 = vrot.slane %v885_v61, 4 }
 0x18d   : >> { %v863_v5 = vrot.slane %v862_v62, 2  ;;  %v869_v8 = vadd.f32 %v868_v63, %v867_v59  ;;  %v881_v16 = vrot.slane %v880_v1, 2  ;;  %v887_v17 = vadd.f32 %v886_v4, %v885_v61 }
 0x18f   : >> { %v864_v18 = vadd.f32 %v863_v5, %v862_v62  ;;  %v870_v19 = vrot.slane %v869_v8, 2  ;;  %v882_v20 = vadd.f32 %v881_v16, %v880_v1  ;;  %v888_v21 = vrot.slane %v887_v17, 2 }
 0x191   : >> { %v865_v22 = vrot.slane %v864_v18, 1  ;;  %v871_v23 = vadd.f32 %v870_v19, %v869_v8  ;;  %v883_v26 = vrot.slane %v882_v20, 1  ;;  %v889_v25 = vadd.f32 %v888_v21, %v887_v17 }
 0x193   : >> { %v872_v27 = vrot.slane %v871_v23, 1  ;;  %v890_v29 = vrot.slane %v889_v25, 1  ;;  %v866_v28 = vadd.f32 %v865_v22, %v864_v18  ;;  %v884_v32 = vadd.f32 %v883_v26, %v882_v20 }
 0x195   : >> { %v873_v30 = vadd.f32 %v872_v27, %v871_v23  ;;  %v891_v33 = vadd.f32 %v890_v29, %v889_v25 }
 0x197   : >> { %v894_v35 = vcombine.low %v866_v28, %v873_v30  ;;  %v914_v36 = vcombine.low %v884_v32, %v891_v33 }
 0x199   : >> { %v901_v37 = vrot.slane %v894_v35, %v900_v31  ;;  %v921_v38 = vrot.slane %v914_v36, %v900_v31 }
 0x19b   : >> { %v908_v39 = vrot.slane %v901_v37, %v900_v31  ;;  %v928_v40 = vrot.slane %v921_v38, %v900_v31  ;;  %127 = sbr.rel (!%p125_p4) target bundleno = 18 (0x12), region = 62 }
 0x19d   : >> { %v910_v41 = vadd.f32 %v908_v39, %v1435_v34  ;;  %v930_v42 = vadd.f32 %v1307_v12, %v928_v40 }
 0x19f   : >> { %911 = vst.msk [vmem:[%s1211_s14] sm:$0x3] %vm1214_vm0, %v910_v41  ;;  %1046 = vst.msk [vmem:[%s1211_s14 + $0x2] sm:$0x3] %vm1214_vm0, %v930_v42 }
 0x1a0 PF: > { %s11_s6 = sadd.s32 1, %s1172_s6  }
 0x1a1   : > { %p8_p5 = scmp.ge.s32.totalorder %s11_s6, 4  }
 0x1a3   :  { %10 = sbr.rel (!%p8_p5) target bundleno = 1 (0x1), region = 73 }

</bundles_post_ra>
